<compile_context>
chip_gen: v6e
topology: v6e:2x2x1
jax: 0.10.0
libtpu: 0.0.40
codegen_flags: <defaults>
</compile_context>

<pallas_src>
import functools

import jax
import jax.numpy as jnp
from jax import lax
from jax.experimental import pallas as pl
from jax.experimental.pallas import tpu as pltpu


def _layer_norm_fp32(x, gamma, beta, eps=1e-5):
    """FP32LayerNorm: normalize in float32, affine with gamma/beta (shape (1, D))."""
    xf = x.astype(jnp.float32)
    mean = jnp.mean(xf, axis=-1, keepdims=True)
    var = jnp.mean(jnp.square(xf - mean), axis=-1, keepdims=True)
    y = (xf - mean) * lax.rsqrt(var + eps)
    return y * gamma.astype(jnp.float32) + beta.astype(jnp.float32)


def perceiver_attention_kernel(img_ref, lat_ref,
                               g1_ref, b1_ref, g2_ref, b2_ref,
                               wq_ref, wkv_ref, wout_ref,
                               out_ref, attn_ref,
                               *, num_heads, block_b):
    rows_img, D = img_ref.shape           # (block_b * n_img, D)
    rows_lat = lat_ref.shape[0]           # block_b * n_lat
    bt = block_b
    n_img = rows_img // bt
    n_lat = rows_lat // bt
    hd = D // num_heads
    cdt = wq_ref.dtype                    # MXU operand dtype (bf16 or f32)

    # ---- FP32 LayerNorms over folded rows ----
    img_n = _layer_norm_fp32(img_ref[...], g1_ref[...], b1_ref[...])   # (bt*n_img, D) f32
    lat_n = _layer_norm_fp32(lat_ref[...], g2_ref[...], b2_ref[...])   # (bt*n_lat, D) f32
    img_c = img_n.astype(cdt)
    lat_c = lat_n.astype(cdt)

    # ---- Projections: weights are (in, out); attention scale folded into Wq.
    #      KV is done as two folded matmuls (image rows / latent rows), which
    #      removes the kv_input concatenate entirely. ----
    dn2 = (((1,), (0,)), ((), ()))
    q = lax.dot_general(lat_c, wq_ref[...], dn2,
                        preferred_element_type=jnp.float32)             # (bt*n_lat, D)
    kv_i = lax.dot_general(img_c, wkv_ref[...], dn2,
                           preferred_element_type=jnp.float32)          # (bt*n_img, 2D)
    kv_l = lax.dot_general(lat_c, wkv_ref[...], dn2,
                           preferred_element_type=jnp.float32)          # (bt*n_lat, 2D)

    # Split back into (batch, seq, D); these reshapes only split leading dims.
    qh_all = q.reshape(bt, n_lat, D).astype(cdt)
    k_i = kv_i[:, :D].reshape(bt, n_img, D).astype(cdt)
    v_i = kv_i[:, D:].reshape(bt, n_img, D).astype(cdt)
    k_l = kv_l[:, :D].reshape(bt, n_lat, D).astype(cdt)
    v_l = kv_l[:, D:].reshape(bt, n_lat, D).astype(cdt)

    dn_s = (((2,), (2,)), ((0,), (0,)))   # (b,q,hd) . (b,k,hd) -> (b,q,k)  (no K transpose)
    dn_o = (((2,), (1,)), ((0,), (0,)))   # (b,q,k)  . (b,k,hd) -> (b,q,hd)

    # ---- Per-head attention, batched over the folded batch block.
    #      Two-piece softmax over {image rows, latent rows}. ----
    for h in range(num_heads):
        sl = slice(h * hd, (h + 1) * hd)
        qh = qh_all[:, :, sl]                                            # (bt, n_lat, hd)
        s_i = lax.dot_general(qh, k_i[:, :, sl], dn_s,
                              preferred_element_type=jnp.float32)        # (bt, n_lat, n_img)
        s_l = lax.dot_general(qh, k_l[:, :, sl], dn_s,
                              preferred_element_type=jnp.float32)        # (bt, n_lat, n_lat)
        m = jnp.maximum(jnp.max(s_i, axis=-1, keepdims=True),
                        jnp.max(s_l, axis=-1, keepdims=True))
        p_i = jnp.exp(s_i - m)
        p_l = jnp.exp(s_l - m)
        denom = (jnp.sum(p_i, axis=-1, keepdims=True)
                 + jnp.sum(p_l, axis=-1, keepdims=True))
        o = lax.dot_general(p_i.astype(cdt), v_i[:, :, sl], dn_o,
                            preferred_element_type=jnp.float32)
        o = o + lax.dot_general(p_l.astype(cdt), v_l[:, :, sl], dn_o,
                                preferred_element_type=jnp.float32)
        o = o * pl.reciprocal(denom, approx=True)                        # (bt, n_lat, hd)
        # Slice-write into the (rows, D) scratch -> no head concatenate.
        attn_ref[:, sl] = o.reshape(bt * n_lat, hd).astype(attn_ref.dtype)

    # ---- Output projection over the folded rows ----
    out = lax.dot_general(attn_ref[...], wout_ref[...], dn2,
                          preferred_element_type=jnp.float32)            # (bt*n_lat, D)
    out_ref[...] = out.astype(out_ref.dtype)


def _pick_block_b(B, n_img, n_lat, target_rows=256):
    """Fold enough batch elements per grid step to give the projections >= target_rows rows."""
    divs = [d for d in range(1, B + 1) if B % d == 0]
    bt = next((d for d in divs if d * n_lat >= target_rows), divs[-1])
    # Row counts of partial blocks must stay sublane-aligned.
    while bt < B and ((bt * n_lat) % 8 or (bt * n_img) % 8):
        bt = next(d for d in divs if d > bt)
    return bt


def perceiver_attention(image_features, latents, params, num_heads,
                        *, matmul_dtype=jnp.bfloat16, block_b=None):
    B, n_img, D = image_features.shape
    _, n_lat, _ = latents.shape
    assert D % num_heads == 0, "in_features must be divisible by num_heads"
    hd = D // num_heads
    # TODO(synk): if D is not a multiple of 128, pad the feature dim in the wrapper
    # so stores stay lane-dense; not needed for typical resampler widths.

    if block_b is None:
        block_b = _pick_block_b(B, n_img, n_lat)
    assert B % block_b == 0

    # Pre-transpose weights to (in, out) once in XLA; fold attention scale into Wq;
    # cast weights to the MXU operand dtype.
    scale = 1.0 / (hd ** 0.5)
    wq_t = (params["wq"].astype(jnp.float32).T * scale).astype(matmul_dtype)   # (D, D)
    wkv_t = params["wkv"].astype(jnp.float32).T.astype(matmul_dtype)           # (D, 2D)
    wout_t = params["wout"].astype(jnp.float32).T.astype(matmul_dtype)         # (D, D)

    g1 = params["ln1_w"].reshape(1, D).astype(jnp.float32)
    b1 = params["ln1_b"].reshape(1, D).astype(jnp.float32)
    g2 = params["ln2_w"].reshape(1, D).astype(jnp.float32)
    b2 = params["ln2_b"].reshape(1, D).astype(jnp.float32)

    # Lane-dense 2-D views (free reshapes in XLA).
    img2d = image_features.reshape(B * n_img, D)
    lat2d = latents.reshape(B * n_lat, D)

    kernel = functools.partial(perceiver_attention_kernel,
                               num_heads=num_heads, block_b=block_b)

    full = lambda shape: pl.BlockSpec(shape, lambda b: (0,) * len(shape))

    # VMEM budget: resident weights + double-buffered I/O blocks + scratch + fp32 temps.
    w_isz = jnp.dtype(matmul_dtype).itemsize
    in_isz = jnp.dtype(latents.dtype).itemsize
    w_bytes = 4 * D * D * w_isz + 4 * D * 4
    io_bytes = block_b * (n_img + 2 * n_lat) * D * in_isz
    scratch_bytes = block_b * n_lat * D * w_isz
    tmp_bytes = block_b * (2 * n_img + 3 * n_lat) * D * 4
    vmem_limit = int(min(64 * 2 ** 20,
                         max(16 * 2 ** 20,
                             2 * (w_bytes + 2 * io_bytes + scratch_bytes + tmp_bytes))))

    out2d = pl.pallas_call(
        kernel,
        out_shape=jax.ShapeDtypeStruct((B * n_lat, D), latents.dtype),
        grid_spec=pltpu.PrefetchScalarGridSpec(
            num_scalar_prefetch=0,
            grid=(B // block_b,),
            in_specs=[
                pl.BlockSpec((block_b * n_img, D), lambda b: (b, 0)),
                pl.BlockSpec((block_b * n_lat, D), lambda b: (b, 0)),
                full((1, D)), full((1, D)), full((1, D)), full((1, D)),
                full((D, D)), full((D, 2 * D)), full((D, D)),
            ],
            out_specs=pl.BlockSpec((block_b * n_lat, D), lambda b: (b, 0)),
            scratch_shapes=[pltpu.VMEM((block_b * n_lat, D), matmul_dtype)],
        ),
        compiler_params=pltpu.CompilerParams(
            dimension_semantics=("parallel",),
            vmem_limit_bytes=vmem_limit),
    )(img2d, lat2d, g1, b1, g2, b2, wq_t, wkv_t, wout_t)

    return out2d.reshape(B, n_lat, D)


def perceiver_attention_ref(image_features, latents, params, num_heads):
    """Pure-JAX reference mirroring the PyTorch forward."""
    B, n_img, D = image_features.shape
    _, n_lat, _ = latents.shape
    hd = D // num_heads
    img_n = _layer_norm_fp32(image_features, params["ln1_w"], params["ln1_b"])
    lat_n = _layer_norm_fp32(latents, params["ln2_w"], params["ln2_b"])
    q = lat_n @ params["wq"].T
    kv_in = jnp.concatenate([img_n, lat_n], axis=1)
    kv = kv_in @ params["wkv"].T
    k, v = kv[..., :D], kv[..., D:]

    def split(t):
        return t.reshape(t.shape[0], t.shape[1], num_heads, hd).transpose(0, 2, 1, 3)

    qh, kh, vh = split(q), split(k), split(v)
    s = jnp.einsum("bhqd,bhkd->bhqk", qh, kh) / jnp.sqrt(jnp.float32(hd))
    p = jax.nn.softmax(s, axis=-1)
    a = jnp.einsum("bhqk,bhkd->bhqd", p, vh)
    a = a.transpose(0, 2, 1, 3).reshape(B, n_lat, D)
    return a @ params["wout"].T


if __name__ == "__main__":
    B, D, num_heads = 2, 128, 4
    n_img, n_lat = 16, 8

    key = jax.random.PRNGKey(0)
    ks = jax.random.split(key, 9)

    image_features = jax.random.normal(ks[0], (B, n_img, D), dtype=jnp.float32)
    latents = jax.random.normal(ks[1], (B, n_lat, D), dtype=jnp.float32)

    params = {
        "wq":   0.05 * jax.random.normal(ks[2], (D, D), dtype=jnp.float32),
        "wkv":  0.05 * jax.random.normal(ks[3], (2 * D, D), dtype=jnp.float32),
        "wout": 0.05 * jax.random.normal(ks[4], (D, D), dtype=jnp.float32),
        "ln1_w": 1.0 + 0.1 * jax.random.normal(ks[5], (D,), dtype=jnp.float32),
        "ln1_b": 0.1 * jax.random.normal(ks[6], (D,), dtype=jnp.float32),
        "ln2_w": 1.0 + 0.1 * jax.random.normal(ks[7], (D,), dtype=jnp.float32),
        "ln2_b": 0.1 * jax.random.normal(ks[8], (D,), dtype=jnp.float32),
    }

    ref = perceiver_attention_ref(image_features, latents, params, num_heads)

    # fp32-MXU path: tight structural/numerical check.
    out_f32 = jax.block_until_ready(
        perceiver_attention(image_features, latents, params, num_heads,
                            matmul_dtype=jnp.float32))
    assert out_f32.shape == (B, n_lat, D), out_f32.shape
    err32 = float(jnp.max(jnp.abs(out_f32 - ref)))
    assert err32 < 2e-3, f"fp32 path max abs err = {err32}"

    # bf16-MXU path (default, optimized): looser tolerance (LN/softmax stay fp32).
    out_bf16 = jax.block_until_ready(
        perceiver_attention(image_features, latents, params, num_heads))
    assert out_bf16.shape == (B, n_lat, D), out_bf16.shape
    err16 = float(jnp.max(jnp.abs(out_bf16 - ref)))
    assert err16 < 2e-2, f"bf16 path max abs err = {err16}"

    print("KERNEL_OK")
</pallas_src>

<mosaic_0001>
module attributes {stable_mosaic.version = 11 : i64} {
  func.func @perceiver_attention_kernel(%arg0: i32, %arg1: memref<32x128xf32, #tpu.memory_space<vmem>>, %arg2: memref<16x128xf32, #tpu.memory_space<vmem>>, %arg3: memref<1x128xf32, #tpu.memory_space<vmem>>, %arg4: memref<1x128xf32, #tpu.memory_space<vmem>>, %arg5: memref<1x128xf32, #tpu.memory_space<vmem>>, %arg6: memref<1x128xf32, #tpu.memory_space<vmem>>, %arg7: memref<128x128xf32, #tpu.memory_space<vmem>>, %arg8: memref<128x256xf32, #tpu.memory_space<vmem>>, %arg9: memref<128x128xf32, #tpu.memory_space<vmem>>, %arg10: memref<16x128xf32, #tpu.memory_space<vmem>>, %arg11: memref<16x128xf32, #tpu.memory_space<vmem>>) attributes {dimension_semantics = [#tpu.dimension_semantics<parallel>], iteration_bounds = array<i64: 1>, scalar_prefetch = 0 : i64, scratch_operands = 1 : i64, tpu.core_type = #tpu.core_type<tc>, window_params = [{transform_indices = @transform_0, window_bounds = array<i64: 32, 128>}, {transform_indices = @transform_1, window_bounds = array<i64: 16, 128>}, {pipeline_mode = #tpu.pipeline_mode<synchronous>, transform_indices = @transform_2, window_bounds = array<i64: 1, 128>}, {pipeline_mode = #tpu.pipeline_mode<synchronous>, transform_indices = @transform_3, window_bounds = array<i64: 1, 128>}, {pipeline_mode = #tpu.pipeline_mode<synchronous>, transform_indices = @transform_4, window_bounds = array<i64: 1, 128>}, {pipeline_mode = #tpu.pipeline_mode<synchronous>, transform_indices = @transform_5, window_bounds = array<i64: 1, 128>}, {pipeline_mode = #tpu.pipeline_mode<synchronous>, transform_indices = @transform_6, window_bounds = array<i64: 128, 128>}, {pipeline_mode = #tpu.pipeline_mode<synchronous>, transform_indices = @transform_7, window_bounds = array<i64: 128, 256>}, {pipeline_mode = #tpu.pipeline_mode<synchronous>, transform_indices = @transform_8, window_bounds = array<i64: 128, 128>}, {transform_indices = @transform_9, window_bounds = array<i64: 16, 128>}]} {
    %c0 = arith.constant 0 : index
    %c0_0 = arith.constant 0 : index
    %0 = vector.load %arg1[%c0, %c0_0] : memref<32x128xf32, #tpu.memory_space<vmem>>, vector<32x128xf32>
    %c0_1 = arith.constant 0 : index
    %c0_2 = arith.constant 0 : index
    %1 = vector.load %arg3[%c0_1, %c0_2] : memref<1x128xf32, #tpu.memory_space<vmem>>, vector<1x128xf32>
    %c0_3 = arith.constant 0 : index
    %c0_4 = arith.constant 0 : index
    %2 = vector.load %arg4[%c0_3, %c0_4] : memref<1x128xf32, #tpu.memory_space<vmem>>, vector<1x128xf32>
    %cst = arith.constant dense<0.000000e+00> : vector<32xf32>
    %3 = vector.multi_reduction <add>, %0, %cst [1] : vector<32x128xf32> to vector<32xf32>
    %4 = vector.shape_cast %3 : vector<32xf32> to vector<32x1xf32>
    %cst_5 = arith.constant 1.280000e+02 : f32
    %5 = vector.broadcast %cst_5 : f32 to vector<32x1xf32>
    %6 = arith.divf %4, %5 : vector<32x1xf32>
    %7 = vector.broadcast %6 : vector<32x1xf32> to vector<32x128xf32>
    %8 = arith.subf %0, %7 : vector<32x128xf32>
    %9 = arith.mulf %8, %8 : vector<32x128xf32>
    %cst_6 = arith.constant dense<0.000000e+00> : vector<32xf32>
    %10 = vector.multi_reduction <add>, %9, %cst_6 [1] : vector<32x128xf32> to vector<32xf32>
    %11 = vector.shape_cast %10 : vector<32xf32> to vector<32x1xf32>
    %cst_7 = arith.constant 1.280000e+02 : f32
    %12 = vector.broadcast %cst_7 : f32 to vector<32x1xf32>
    %13 = arith.divf %11, %12 : vector<32x1xf32>
    %14 = vector.broadcast %6 : vector<32x1xf32> to vector<32x128xf32>
    %15 = arith.subf %0, %14 : vector<32x128xf32>
    %cst_8 = arith.constant 9.99999974E-6 : f32
    %16 = vector.broadcast %cst_8 : f32 to vector<32x1xf32>
    %17 = arith.addf %13, %16 : vector<32x1xf32>
    %18 = math.rsqrt %17 : vector<32x1xf32>
    %19 = vector.broadcast %18 : vector<32x1xf32> to vector<32x128xf32>
    %20 = arith.mulf %15, %19 : vector<32x128xf32>
    %21 = vector.broadcast %1 : vector<1x128xf32> to vector<32x128xf32>
    %22 = arith.mulf %20, %21 : vector<32x128xf32>
    %23 = vector.broadcast %2 : vector<1x128xf32> to vector<32x128xf32>
    %24 = arith.addf %22, %23 : vector<32x128xf32>
    %c0_9 = arith.constant 0 : index
    %c0_10 = arith.constant 0 : index
    %25 = vector.load %arg2[%c0_9, %c0_10] : memref<16x128xf32, #tpu.memory_space<vmem>>, vector<16x128xf32>
    %c0_11 = arith.constant 0 : index
    %c0_12 = arith.constant 0 : index
    %26 = vector.load %arg5[%c0_11, %c0_12] : memref<1x128xf32, #tpu.memory_space<vmem>>, vector<1x128xf32>
    %c0_13 = arith.constant 0 : index
    %c0_14 = arith.constant 0 : index
    %27 = vector.load %arg6[%c0_13, %c0_14] : memref<1x128xf32, #tpu.memory_space<vmem>>, vector<1x128xf32>
    %cst_15 = arith.constant dense<0.000000e+00> : vector<16xf32>
    %28 = vector.multi_reduction <add>, %25, %cst_15 [1] : vector<16x128xf32> to vector<16xf32>
    %29 = vector.shape_cast %28 : vector<16xf32> to vector<16x1xf32>
    %cst_16 = arith.constant 1.280000e+02 : f32
    %30 = vector.broadcast %cst_16 : f32 to vector<16x1xf32>
    %31 = arith.divf %29, %30 : vector<16x1xf32>
    %32 = vector.broadcast %31 : vector<16x1xf32> to vector<16x128xf32>
    %33 = arith.subf %25, %32 : vector<16x128xf32>
    %34 = arith.mulf %33, %33 : vector<16x128xf32>
    %cst_17 = arith.constant dense<0.000000e+00> : vector<16xf32>
    %35 = vector.multi_reduction <add>, %34, %cst_17 [1] : vector<16x128xf32> to vector<16xf32>
    %36 = vector.shape_cast %35 : vector<16xf32> to vector<16x1xf32>
    %cst_18 = arith.constant 1.280000e+02 : f32
    %37 = vector.broadcast %cst_18 : f32 to vector<16x1xf32>
    %38 = arith.divf %36, %37 : vector<16x1xf32>
    %39 = vector.broadcast %31 : vector<16x1xf32> to vector<16x128xf32>
    %40 = arith.subf %25, %39 : vector<16x128xf32>
    %cst_19 = arith.constant 9.99999974E-6 : f32
    %41 = vector.broadcast %cst_19 : f32 to vector<16x1xf32>
    %42 = arith.addf %38, %41 : vector<16x1xf32>
    %43 = math.rsqrt %42 : vector<16x1xf32>
    %44 = vector.broadcast %43 : vector<16x1xf32> to vector<16x128xf32>
    %45 = arith.mulf %40, %44 : vector<16x128xf32>
    %46 = vector.broadcast %26 : vector<1x128xf32> to vector<16x128xf32>
    %47 = arith.mulf %45, %46 : vector<16x128xf32>
    %48 = vector.broadcast %27 : vector<1x128xf32> to vector<16x128xf32>
    %49 = arith.addf %47, %48 : vector<16x128xf32>
    %c0_20 = arith.constant 0 : index
    %c0_21 = arith.constant 0 : index
    %50 = vector.load %arg7[%c0_20, %c0_21] : memref<128x128xf32, #tpu.memory_space<vmem>>, vector<128x128xf32>
    %cst_22 = arith.constant dense<0.000000e+00> : vector<16x128xf32>
    %51 = tpu.matmul %49, %50, %cst_22 {dimension_numbers = #tpu.dot_dimension_numbers<[1], [0], [0], [1], [0, 0, 1, 1], [], []>} : vector<16x128xf32>, vector<128x128xf32>, vector<16x128xf32> -> vector<16x128xf32>
    %c0_23 = arith.constant 0 : index
    %c0_24 = arith.constant 0 : index
    %52 = vector.load %arg8[%c0_23, %c0_24] : memref<128x256xf32, #tpu.memory_space<vmem>>, vector<128x256xf32>
    %cst_25 = arith.constant dense<0.000000e+00> : vector<32x256xf32>
    %53 = tpu.matmul %24, %52, %cst_25 {dimension_numbers = #tpu.dot_dimension_numbers<[1], [0], [0], [1], [0, 0, 1, 1], [], []>} : vector<32x128xf32>, vector<128x256xf32>, vector<32x256xf32> -> vector<32x256xf32>
    %c0_26 = arith.constant 0 : index
    %c0_27 = arith.constant 0 : index
    %54 = vector.load %arg8[%c0_26, %c0_27] : memref<128x256xf32, #tpu.memory_space<vmem>>, vector<128x256xf32>
    %cst_28 = arith.constant dense<0.000000e+00> : vector<16x256xf32>
    %55 = tpu.matmul %49, %54, %cst_28 {dimension_numbers = #tpu.dot_dimension_numbers<[1], [0], [0], [1], [0, 0, 1, 1], [], []>} : vector<16x128xf32>, vector<128x256xf32>, vector<16x256xf32> -> vector<16x256xf32>
    %56 = vector.shape_cast %51 : vector<16x128xf32> to vector<2x8x128xf32>
    %57 = vector.extract_strided_slice %53 {offsets = [0, 0], sizes = [32, 128], strides = [1, 1]} : vector<32x256xf32> to vector<32x128xf32>
    %58 = vector.shape_cast %57 : vector<32x128xf32> to vector<2x16x128xf32>
    %59 = vector.extract_strided_slice %53 {offsets = [0, 128], sizes = [32, 128], strides = [1, 1]} : vector<32x256xf32> to vector<32x128xf32>
    %60 = vector.shape_cast %59 : vector<32x128xf32> to vector<2x16x128xf32>
    %61 = vector.extract_strided_slice %55 {offsets = [0, 0], sizes = [16, 128], strides = [1, 1]} : vector<16x256xf32> to vector<16x128xf32>
    %62 = vector.shape_cast %61 : vector<16x128xf32> to vector<2x8x128xf32>
    %63 = vector.extract_strided_slice %55 {offsets = [0, 128], sizes = [16, 128], strides = [1, 1]} : vector<16x256xf32> to vector<16x128xf32>
    %64 = vector.shape_cast %63 : vector<16x128xf32> to vector<2x8x128xf32>
    %65 = vector.extract_strided_slice %56 {offsets = [0, 0, 0], sizes = [2, 8, 32], strides = [1, 1, 1]} : vector<2x8x128xf32> to vector<2x8x32xf32>
    %66 = vector.extract_strided_slice %58 {offsets = [0, 0, 0], sizes = [2, 16, 32], strides = [1, 1, 1]} : vector<2x16x128xf32> to vector<2x16x32xf32>
    %cst_29 = arith.constant dense<0.000000e+00> : vector<2x8x16xf32>
    %67 = tpu.matmul %65, %66, %cst_29 {dimension_numbers = #tpu.dot_dimension_numbers<[2], [2], [1], [1], [0, 0, 0, 1, 1, 1], [0], [0]>} : vector<2x8x32xf32>, vector<2x16x32xf32>, vector<2x8x16xf32> -> vector<2x8x16xf32>
    %68 = vector.extract_strided_slice %62 {offsets = [0, 0, 0], sizes = [2, 8, 32], strides = [1, 1, 1]} : vector<2x8x128xf32> to vector<2x8x32xf32>
    %cst_30 = arith.constant dense<0.000000e+00> : vector<2x8x8xf32>
    %69 = tpu.matmul %65, %68, %cst_30 {dimension_numbers = #tpu.dot_dimension_numbers<[2], [2], [1], [1], [0, 0, 0, 1, 1, 1], [0], [0]>} : vector<2x8x32xf32>, vector<2x8x32xf32>, vector<2x8x8xf32> -> vector<2x8x8xf32>
    %cst_31 = arith.constant dense<0xFF800000> : vector<2x8xf32>
    %70 = vector.multi_reduction <maximumf>, %67, %cst_31 [2] : vector<2x8x16xf32> to vector<2x8xf32>
    %71 = vector.shape_cast %70 : vector<2x8xf32> to vector<2x8x1xf32>
    %cst_32 = arith.constant dense<0xFF800000> : vector<2x8xf32>
    %72 = vector.multi_reduction <maximumf>, %69, %cst_32 [2] : vector<2x8x8xf32> to vector<2x8xf32>
    %73 = vector.shape_cast %72 : vector<2x8xf32> to vector<2x8x1xf32>
    %74 = arith.maximumf %71, %73 : vector<2x8x1xf32>
    %75 = vector.broadcast %74 : vector<2x8x1xf32> to vector<2x8x16xf32>
    %76 = arith.subf %67, %75 : vector<2x8x16xf32>
    %77 = math.exp %76 : vector<2x8x16xf32>
    %78 = vector.broadcast %74 : vector<2x8x1xf32> to vector<2x8x8xf32>
    %79 = arith.subf %69, %78 : vector<2x8x8xf32>
    %80 = math.exp %79 : vector<2x8x8xf32>
    %cst_33 = arith.constant dense<0.000000e+00> : vector<2x8xf32>
    %81 = vector.multi_reduction <add>, %77, %cst_33 [2] : vector<2x8x16xf32> to vector<2x8xf32>
    %82 = vector.shape_cast %81 : vector<2x8xf32> to vector<2x8x1xf32>
    %cst_34 = arith.constant dense<0.000000e+00> : vector<2x8xf32>
    %83 = vector.multi_reduction <add>, %80, %cst_34 [2] : vector<2x8x8xf32> to vector<2x8xf32>
    %84 = vector.shape_cast %83 : vector<2x8xf32> to vector<2x8x1xf32>
    %85 = arith.addf %82, %84 : vector<2x8x1xf32>
    %86 = vector.extract_strided_slice %60 {offsets = [0, 0, 0], sizes = [2, 16, 32], strides = [1, 1, 1]} : vector<2x16x128xf32> to vector<2x16x32xf32>
    %cst_35 = arith.constant dense<0.000000e+00> : vector<2x8x32xf32>
    %87 = tpu.matmul %77, %86, %cst_35 {dimension_numbers = #tpu.dot_dimension_numbers<[2], [1], [1], [2], [0, 0, 0, 1, 1, 2], [0], [0]>} : vector<2x8x16xf32>, vector<2x16x32xf32>, vector<2x8x32xf32> -> vector<2x8x32xf32>
    %88 = vector.extract_strided_slice %64 {offsets = [0, 0, 0], sizes = [2, 8, 32], strides = [1, 1, 1]} : vector<2x8x128xf32> to vector<2x8x32xf32>
    %cst_36 = arith.constant dense<0.000000e+00> : vector<2x8x32xf32>
    %89 = tpu.matmul %80, %88, %cst_36 {dimension_numbers = #tpu.dot_dimension_numbers<[2], [1], [1], [2], [0, 0, 0, 1, 1, 2], [0], [0]>} : vector<2x8x8xf32>, vector<2x8x32xf32>, vector<2x8x32xf32> -> vector<2x8x32xf32>
    %90 = arith.addf %87, %89 : vector<2x8x32xf32>
    %91 = tpu.reciprocal %85 {approx = true} : vector<2x8x1xf32> -> vector<2x8x1xf32>
    %92 = vector.broadcast %91 : vector<2x8x1xf32> to vector<2x8x32xf32>
    %93 = arith.mulf %90, %92 : vector<2x8x32xf32>
    %94 = vector.shape_cast %93 : vector<2x8x32xf32> to vector<16x32xf32>
    %c0_37 = arith.constant 0 : index
    %c0_38 = arith.constant 0 : index
    %95 = vector.load %arg11[%c0_37, %c0_38] : memref<16x128xf32, #tpu.memory_space<vmem>>, vector<16x32xf32>
    tpu.vector_store %arg11[%c0_37, %c0_38], %94 {strides = array<i32>} : memref<16x128xf32, #tpu.memory_space<vmem>>, vector<16x32xf32>,
    %96 = vector.extract_strided_slice %56 {offsets = [0, 0, 32], sizes = [2, 8, 32], strides = [1, 1, 1]} : vector<2x8x128xf32> to vector<2x8x32xf32>
    %97 = vector.extract_strided_slice %58 {offsets = [0, 0, 32], sizes = [2, 16, 32], strides = [1, 1, 1]} : vector<2x16x128xf32> to vector<2x16x32xf32>
    %cst_39 = arith.constant dense<0.000000e+00> : vector<2x8x16xf32>
    %98 = tpu.matmul %96, %97, %cst_39 {dimension_numbers = #tpu.dot_dimension_numbers<[2], [2], [1], [1], [0, 0, 0, 1, 1, 1], [0], [0]>} : vector<2x8x32xf32>, vector<2x16x32xf32>, vector<2x8x16xf32> -> vector<2x8x16xf32>
    %99 = vector.extract_strided_slice %62 {offsets = [0, 0, 32], sizes = [2, 8, 32], strides = [1, 1, 1]} : vector<2x8x128xf32> to vector<2x8x32xf32>
    %cst_40 = arith.constant dense<0.000000e+00> : vector<2x8x8xf32>
    %100 = tpu.matmul %96, %99, %cst_40 {dimension_numbers = #tpu.dot_dimension_numbers<[2], [2], [1], [1], [0, 0, 0, 1, 1, 1], [0], [0]>} : vector<2x8x32xf32>, vector<2x8x32xf32>, vector<2x8x8xf32> -> vector<2x8x8xf32>
    %cst_41 = arith.constant dense<0xFF800000> : vector<2x8xf32>
    %101 = vector.multi_reduction <maximumf>, %98, %cst_41 [2] : vector<2x8x16xf32> to vector<2x8xf32>
    %102 = vector.shape_cast %101 : vector<2x8xf32> to vector<2x8x1xf32>
    %cst_42 = arith.constant dense<0xFF800000> : vector<2x8xf32>
    %103 = vector.multi_reduction <maximumf>, %100, %cst_42 [2] : vector<2x8x8xf32> to vector<2x8xf32>
    %104 = vector.shape_cast %103 : vector<2x8xf32> to vector<2x8x1xf32>
    %105 = arith.maximumf %102, %104 : vector<2x8x1xf32>
    %106 = vector.broadcast %105 : vector<2x8x1xf32> to vector<2x8x16xf32>
    %107 = arith.subf %98, %106 : vector<2x8x16xf32>
    %108 = math.exp %107 : vector<2x8x16xf32>
    %109 = vector.broadcast %105 : vector<2x8x1xf32> to vector<2x8x8xf32>
    %110 = arith.subf %100, %109 : vector<2x8x8xf32>
    %111 = math.exp %110 : vector<2x8x8xf32>
    %cst_43 = arith.constant dense<0.000000e+00> : vector<2x8xf32>
    %112 = vector.multi_reduction <add>, %108, %cst_43 [2] : vector<2x8x16xf32> to vector<2x8xf32>
    %113 = vector.shape_cast %112 : vector<2x8xf32> to vector<2x8x1xf32>
    %cst_44 = arith.constant dense<0.000000e+00> : vector<2x8xf32>
    %114 = vector.multi_reduction <add>, %111, %cst_44 [2] : vector<2x8x8xf32> to vector<2x8xf32>
    %115 = vector.shape_cast %114 : vector<2x8xf32> to vector<2x8x1xf32>
    %116 = arith.addf %113, %115 : vector<2x8x1xf32>
    %117 = vector.extract_strided_slice %60 {offsets = [0, 0, 32], sizes = [2, 16, 32], strides = [1, 1, 1]} : vector<2x16x128xf32> to vector<2x16x32xf32>
    %cst_45 = arith.constant dense<0.000000e+00> : vector<2x8x32xf32>
    %118 = tpu.matmul %108, %117, %cst_45 {dimension_numbers = #tpu.dot_dimension_numbers<[2], [1], [1], [2], [0, 0, 0, 1, 1, 2], [0], [0]>} : vector<2x8x16xf32>, vector<2x16x32xf32>, vector<2x8x32xf32> -> vector<2x8x32xf32>
    %119 = vector.extract_strided_slice %64 {offsets = [0, 0, 32], sizes = [2, 8, 32], strides = [1, 1, 1]} : vector<2x8x128xf32> to vector<2x8x32xf32>
    %cst_46 = arith.constant dense<0.000000e+00> : vector<2x8x32xf32>
    %120 = tpu.matmul %111, %119, %cst_46 {dimension_numbers = #tpu.dot_dimension_numbers<[2], [1], [1], [2], [0, 0, 0, 1, 1, 2], [0], [0]>} : vector<2x8x8xf32>, vector<2x8x32xf32>, vector<2x8x32xf32> -> vector<2x8x32xf32>
    %121 = arith.addf %118, %120 : vector<2x8x32xf32>
    %122 = tpu.reciprocal %116 {approx = true} : vector<2x8x1xf32> -> vector<2x8x1xf32>
    %123 = vector.broadcast %122 : vector<2x8x1xf32> to vector<2x8x32xf32>
    %124 = arith.mulf %121, %123 : vector<2x8x32xf32>
    %125 = vector.shape_cast %124 : vector<2x8x32xf32> to vector<16x32xf32>
    %c0_47 = arith.constant 0 : index
    %c32 = arith.constant 32 : index
    %126 = vector.load %arg11[%c0_47, %c32] : memref<16x128xf32, #tpu.memory_space<vmem>>, vector<16x32xf32>
    tpu.vector_store %arg11[%c0_47, %c32], %125 {strides = array<i32>} : memref<16x128xf32, #tpu.memory_space<vmem>>, vector<16x32xf32>,
    %127 = vector.extract_strided_slice %56 {offsets = [0, 0, 64], sizes = [2, 8, 32], strides = [1, 1, 1]} : vector<2x8x128xf32> to vector<2x8x32xf32>
    %128 = vector.extract_strided_slice %58 {offsets = [0, 0, 64], sizes = [2, 16, 32], strides = [1, 1, 1]} : vector<2x16x128xf32> to vector<2x16x32xf32>
    %cst_48 = arith.constant dense<0.000000e+00> : vector<2x8x16xf32>
    %129 = tpu.matmul %127, %128, %cst_48 {dimension_numbers = #tpu.dot_dimension_numbers<[2], [2], [1], [1], [0, 0, 0, 1, 1, 1], [0], [0]>} : vector<2x8x32xf32>, vector<2x16x32xf32>, vector<2x8x16xf32> -> vector<2x8x16xf32>
    %130 = vector.extract_strided_slice %62 {offsets = [0, 0, 64], sizes = [2, 8, 32], strides = [1, 1, 1]} : vector<2x8x128xf32> to vector<2x8x32xf32>
    %cst_49 = arith.constant dense<0.000000e+00> : vector<2x8x8xf32>
    %131 = tpu.matmul %127, %130, %cst_49 {dimension_numbers = #tpu.dot_dimension_numbers<[2], [2], [1], [1], [0, 0, 0, 1, 1, 1], [0], [0]>} : vector<2x8x32xf32>, vector<2x8x32xf32>, vector<2x8x8xf32> -> vector<2x8x8xf32>
    %cst_50 = arith.constant dense<0xFF800000> : vector<2x8xf32>
    %132 = vector.multi_reduction <maximumf>, %129, %cst_50 [2] : vector<2x8x16xf32> to vector<2x8xf32>
    %133 = vector.shape_cast %132 : vector<2x8xf32> to vector<2x8x1xf32>
    %cst_51 = arith.constant dense<0xFF800000> : vector<2x8xf32>
    %134 = vector.multi_reduction <maximumf>, %131, %cst_51 [2] : vector<2x8x8xf32> to vector<2x8xf32>
    %135 = vector.shape_cast %134 : vector<2x8xf32> to vector<2x8x1xf32>
    %136 = arith.maximumf %133, %135 : vector<2x8x1xf32>
    %137 = vector.broadcast %136 : vector<2x8x1xf32> to vector<2x8x16xf32>
    %138 = arith.subf %129, %137 : vector<2x8x16xf32>
    %139 = math.exp %138 : vector<2x8x16xf32>
    %140 = vector.broadcast %136 : vector<2x8x1xf32> to vector<2x8x8xf32>
    %141 = arith.subf %131, %140 : vector<2x8x8xf32>
    %142 = math.exp %141 : vector<2x8x8xf32>
    %cst_52 = arith.constant dense<0.000000e+00> : vector<2x8xf32>
    %143 = vector.multi_reduction <add>, %139, %cst_52 [2] : vector<2x8x16xf32> to vector<2x8xf32>
    %144 = vector.shape_cast %143 : vector<2x8xf32> to vector<2x8x1xf32>
    %cst_53 = arith.constant dense<0.000000e+00> : vector<2x8xf32>
    %145 = vector.multi_reduction <add>, %142, %cst_53 [2] : vector<2x8x8xf32> to vector<2x8xf32>
    %146 = vector.shape_cast %145 : vector<2x8xf32> to vector<2x8x1xf32>
    %147 = arith.addf %144, %146 : vector<2x8x1xf32>
    %148 = vector.extract_strided_slice %60 {offsets = [0, 0, 64], sizes = [2, 16, 32], strides = [1, 1, 1]} : vector<2x16x128xf32> to vector<2x16x32xf32>
    %cst_54 = arith.constant dense<0.000000e+00> : vector<2x8x32xf32>
    %149 = tpu.matmul %139, %148, %cst_54 {dimension_numbers = #tpu.dot_dimension_numbers<[2], [1], [1], [2], [0, 0, 0, 1, 1, 2], [0], [0]>} : vector<2x8x16xf32>, vector<2x16x32xf32>, vector<2x8x32xf32> -> vector<2x8x32xf32>
    %150 = vector.extract_strided_slice %64 {offsets = [0, 0, 64], sizes = [2, 8, 32], strides = [1, 1, 1]} : vector<2x8x128xf32> to vector<2x8x32xf32>
    %cst_55 = arith.constant dense<0.000000e+00> : vector<2x8x32xf32>
    %151 = tpu.matmul %142, %150, %cst_55 {dimension_numbers = #tpu.dot_dimension_numbers<[2], [1], [1], [2], [0, 0, 0, 1, 1, 2], [0], [0]>} : vector<2x8x8xf32>, vector<2x8x32xf32>, vector<2x8x32xf32> -> vector<2x8x32xf32>
    %152 = arith.addf %149, %151 : vector<2x8x32xf32>
    %153 = tpu.reciprocal %147 {approx = true} : vector<2x8x1xf32> -> vector<2x8x1xf32>
    %154 = vector.broadcast %153 : vector<2x8x1xf32> to vector<2x8x32xf32>
    %155 = arith.mulf %152, %154 : vector<2x8x32xf32>
    %156 = vector.shape_cast %155 : vector<2x8x32xf32> to vector<16x32xf32>
    %c0_56 = arith.constant 0 : index
    %c64 = arith.constant 64 : index
    %157 = vector.load %arg11[%c0_56, %c64] : memref<16x128xf32, #tpu.memory_space<vmem>>, vector<16x32xf32>
    tpu.vector_store %arg11[%c0_56, %c64], %156 {strides = array<i32>} : memref<16x128xf32, #tpu.memory_space<vmem>>, vector<16x32xf32>,
    %158 = vector.extract_strided_slice %56 {offsets = [0, 0, 96], sizes = [2, 8, 32], strides = [1, 1, 1]} : vector<2x8x128xf32> to vector<2x8x32xf32>
    %159 = vector.extract_strided_slice %58 {offsets = [0, 0, 96], sizes = [2, 16, 32], strides = [1, 1, 1]} : vector<2x16x128xf32> to vector<2x16x32xf32>
    %cst_57 = arith.constant dense<0.000000e+00> : vector<2x8x16xf32>
    %160 = tpu.matmul %158, %159, %cst_57 {dimension_numbers = #tpu.dot_dimension_numbers<[2], [2], [1], [1], [0, 0, 0, 1, 1, 1], [0], [0]>} : vector<2x8x32xf32>, vector<2x16x32xf32>, vector<2x8x16xf32> -> vector<2x8x16xf32>
    %161 = vector.extract_strided_slice %62 {offsets = [0, 0, 96], sizes = [2, 8, 32], strides = [1, 1, 1]} : vector<2x8x128xf32> to vector<2x8x32xf32>
    %cst_58 = arith.constant dense<0.000000e+00> : vector<2x8x8xf32>
    %162 = tpu.matmul %158, %161, %cst_58 {dimension_numbers = #tpu.dot_dimension_numbers<[2], [2], [1], [1], [0, 0, 0, 1, 1, 1], [0], [0]>} : vector<2x8x32xf32>, vector<2x8x32xf32>, vector<2x8x8xf32> -> vector<2x8x8xf32>
    %cst_59 = arith.constant dense<0xFF800000> : vector<2x8xf32>
    %163 = vector.multi_reduction <maximumf>, %160, %cst_59 [2] : vector<2x8x16xf32> to vector<2x8xf32>
    %164 = vector.shape_cast %163 : vector<2x8xf32> to vector<2x8x1xf32>
    %cst_60 = arith.constant dense<0xFF800000> : vector<2x8xf32>
    %165 = vector.multi_reduction <maximumf>, %162, %cst_60 [2] : vector<2x8x8xf32> to vector<2x8xf32>
    %166 = vector.shape_cast %165 : vector<2x8xf32> to vector<2x8x1xf32>
    %167 = arith.maximumf %164, %166 : vector<2x8x1xf32>
    %168 = vector.broadcast %167 : vector<2x8x1xf32> to vector<2x8x16xf32>
    %169 = arith.subf %160, %168 : vector<2x8x16xf32>
    %170 = math.exp %169 : vector<2x8x16xf32>
    %171 = vector.broadcast %167 : vector<2x8x1xf32> to vector<2x8x8xf32>
    %172 = arith.subf %162, %171 : vector<2x8x8xf32>
    %173 = math.exp %172 : vector<2x8x8xf32>
    %cst_61 = arith.constant dense<0.000000e+00> : vector<2x8xf32>
    %174 = vector.multi_reduction <add>, %170, %cst_61 [2] : vector<2x8x16xf32> to vector<2x8xf32>
    %175 = vector.shape_cast %174 : vector<2x8xf32> to vector<2x8x1xf32>
    %cst_62 = arith.constant dense<0.000000e+00> : vector<2x8xf32>
    %176 = vector.multi_reduction <add>, %173, %cst_62 [2] : vector<2x8x8xf32> to vector<2x8xf32>
    %177 = vector.shape_cast %176 : vector<2x8xf32> to vector<2x8x1xf32>
    %178 = arith.addf %175, %177 : vector<2x8x1xf32>
    %179 = vector.extract_strided_slice %60 {offsets = [0, 0, 96], sizes = [2, 16, 32], strides = [1, 1, 1]} : vector<2x16x128xf32> to vector<2x16x32xf32>
    %cst_63 = arith.constant dense<0.000000e+00> : vector<2x8x32xf32>
    %180 = tpu.matmul %170, %179, %cst_63 {dimension_numbers = #tpu.dot_dimension_numbers<[2], [1], [1], [2], [0, 0, 0, 1, 1, 2], [0], [0]>} : vector<2x8x16xf32>, vector<2x16x32xf32>, vector<2x8x32xf32> -> vector<2x8x32xf32>
    %181 = vector.extract_strided_slice %64 {offsets = [0, 0, 96], sizes = [2, 8, 32], strides = [1, 1, 1]} : vector<2x8x128xf32> to vector<2x8x32xf32>
    %cst_64 = arith.constant dense<0.000000e+00> : vector<2x8x32xf32>
    %182 = tpu.matmul %173, %181, %cst_64 {dimension_numbers = #tpu.dot_dimension_numbers<[2], [1], [1], [2], [0, 0, 0, 1, 1, 2], [0], [0]>} : vector<2x8x8xf32>, vector<2x8x32xf32>, vector<2x8x32xf32> -> vector<2x8x32xf32>
    %183 = arith.addf %180, %182 : vector<2x8x32xf32>
    %184 = tpu.reciprocal %178 {approx = true} : vector<2x8x1xf32> -> vector<2x8x1xf32>
    %185 = vector.broadcast %184 : vector<2x8x1xf32> to vector<2x8x32xf32>
    %186 = arith.mulf %183, %185 : vector<2x8x32xf32>
    %187 = vector.shape_cast %186 : vector<2x8x32xf32> to vector<16x32xf32>
    %c0_65 = arith.constant 0 : index
    %c96 = arith.constant 96 : index
    %188 = vector.load %arg11[%c0_65, %c96] : memref<16x128xf32, #tpu.memory_space<vmem>>, vector<16x32xf32>
    tpu.vector_store %arg11[%c0_65, %c96], %187 {strides = array<i32>} : memref<16x128xf32, #tpu.memory_space<vmem>>, vector<16x32xf32>,
    %c0_66 = arith.constant 0 : index
    %c0_67 = arith.constant 0 : index
    %189 = vector.load %arg11[%c0_66, %c0_67] : memref<16x128xf32, #tpu.memory_space<vmem>>, vector<16x128xf32>
    %c0_68 = arith.constant 0 : index
    %c0_69 = arith.constant 0 : index
    %190 = vector.load %arg9[%c0_68, %c0_69] : memref<128x128xf32, #tpu.memory_space<vmem>>, vector<128x128xf32>
    %cst_70 = arith.constant dense<0.000000e+00> : vector<16x128xf32>
    %191 = tpu.matmul %189, %190, %cst_70 {dimension_numbers = #tpu.dot_dimension_numbers<[1], [0], [0], [1], [0, 0, 1, 1], [], []>} : vector<16x128xf32>, vector<128x128xf32>, vector<16x128xf32> -> vector<16x128xf32>
    %c0_71 = arith.constant 0 : index
    %c0_72 = arith.constant 0 : index
    %192 = vector.load %arg10[%c0_71, %c0_72] : memref<16x128xf32, #tpu.memory_space<vmem>>, vector<16x128xf32>
    tpu.vector_store %arg10[%c0_71, %c0_72], %191 {strides = array<i32>} : memref<16x128xf32, #tpu.memory_space<vmem>>, vector<16x128xf32>,
    return
  }
  func.func @transform_0(%arg0: i32) -> (i32, i32) {
    %c0_i32 = arith.constant 0 : i32
    %c0_i32_0 = arith.constant 0 : i32
    return %arg0, %c0_i32 : i32, i32
  }
  func.func @transform_1(%arg0: i32) -> (i32, i32) {
    %c0_i32 = arith.constant 0 : i32
    %c0_i32_0 = arith.constant 0 : i32
    return %arg0, %c0_i32 : i32, i32
  }
  func.func @transform_2(%arg0: i32) -> (i32, i32) {
    %c0_i32 = arith.constant 0 : i32
    %c0_i32_0 = arith.constant 0 : i32
    %c0_i32_1 = arith.constant 0 : i32
    return %c0_i32, %c0_i32_0 : i32, i32
  }
  func.func @transform_3(%arg0: i32) -> (i32, i32) {
    %c0_i32 = arith.constant 0 : i32
    %c0_i32_0 = arith.constant 0 : i32
    %c0_i32_1 = arith.constant 0 : i32
    return %c0_i32, %c0_i32_0 : i32, i32
  }
  func.func @transform_4(%arg0: i32) -> (i32, i32) {
    %c0_i32 = arith.constant 0 : i32
    %c0_i32_0 = arith.constant 0 : i32
    %c0_i32_1 = arith.constant 0 : i32
    return %c0_i32, %c0_i32_0 : i32, i32
  }
  func.func @transform_5(%arg0: i32) -> (i32, i32) {
    %c0_i32 = arith.constant 0 : i32
    %c0_i32_0 = arith.constant 0 : i32
    %c0_i32_1 = arith.constant 0 : i32
    return %c0_i32, %c0_i32_0 : i32, i32
  }
  func.func @transform_6(%arg0: i32) -> (i32, i32) {
    %c0_i32 = arith.constant 0 : i32
    %c0_i32_0 = arith.constant 0 : i32
    %c0_i32_1 = arith.constant 0 : i32
    return %c0_i32, %c0_i32_0 : i32, i32
  }
  func.func @transform_7(%arg0: i32) -> (i32, i32) {
    %c0_i32 = arith.constant 0 : i32
    %c0_i32_0 = arith.constant 0 : i32
    %c0_i32_1 = arith.constant 0 : i32
    return %c0_i32, %c0_i32_0 : i32, i32
  }
  func.func @transform_8(%arg0: i32) -> (i32, i32) {
    %c0_i32 = arith.constant 0 : i32
    %c0_i32_0 = arith.constant 0 : i32
    %c0_i32_1 = arith.constant 0 : i32
    return %c0_i32, %c0_i32_0 : i32, i32
  }
  func.func @transform_9(%arg0: i32) -> (i32, i32) {
    %c0_i32 = arith.constant 0 : i32
    %c0_i32_0 = arith.constant 0 : i32
    return %arg0, %c0_i32 : i32, i32
  }
}

</mosaic_0001>

<bundles_post_ra>
// kernel: tpu_custom_call.1
= control target key start
LH: loop header
LB: loop body
LE: loop exit
PB: predicated region body
PF: predicated region fallthrough
CT: control target
= control target key end

     0   :  { %14 = vsyncpa [#allocation4], 0  ;;  %s4618_s0 = inlined_call_operand.hbm [shape: f32[32,128], index: 0, kind: input, shape index: {}]   ;;  %s4619_s1 = inlined_call_operand.hbm [shape: f32[16,128], index: 1, kind: input, shape index: {}]   ;;  %s4620_s2 = inlined_call_operand.vmem [shape: f32[1,128], index: 2, kind: input, shape index: {}]   ;;  %s4621_s3 = inlined_call_operand.vmem [shape: f32[1,128], index: 3, kind: input, shape index: {}]   ;;  %s4622_s4 = inlined_call_operand.vmem [shape: f32[1,128], index: 4, kind: input, shape index: {}]   ;;  %s4623_s5 = inlined_call_operand.vmem [shape: f32[1,128], index: 5, kind: input, shape index: {}]   ;;  %s4624_s6 = inlined_call_operand.hbm [shape: f32[128,128], index: 6, kind: input, shape index: {}]   ;;  %s4625_s7 = inlined_call_operand.hbm [shape: f32[128,256], index: 7, kind: input, shape index: {}]   ;;  %s4626_s8 = inlined_call_operand.hbm [shape: f32[128,128], index: 8, kind: input, shape index: {}]   ;;  %s4627_s9 = inlined_call_operand.hbm [shape: f32[16,128], index: 9, kind: output, shape index: {}]  }
   0x1   :  { %15 = vsyncpa [#allocation7], 0 }
   0x2   :  { %16 = vsyncpa [#allocation10], 0 }
   0x3   :  { %17 = vsyncpa [#allocation5], 0  ;;  %s3940_s30 = smov [#allocation6]   ;;  %s3941_s11 = smov [#allocation9]  }
   0x4   :  { %s35_s10 = sshll.u32 %s3940_s30, 4  ;;  %s67_s12 = sshll.u32 %s3941_s11, 4  ;;  %s36_s10 = int_to_ptr.vmem [resolvable:$true] %s35_s10  ;;  %s68_s12 = int_to_ptr.vmem [resolvable:$true] %s67_s12 }
   0x5   :  { %s3820_s13 = scalar_lea.vmem %s36_s10, 256  ;;  %p3825_p1 = scmp.lt.s32.totalorder %s36_s10, %s36_s10 }
   0x6   :  { %p3821_p0 = scmp.ne.s32.totalorder %s36_s10, %s3820_s13  ;;  %p3826_p2 = scmp.lt.s32.totalorder %s3820_s13, %s3820_s13 }
   0x8   :  { %p3827_p3 = por %p3826_p2, %p3825_p1 }
   0xa   :  { %p3828_p4 = pnand %p3827_p3, %p3821_p0 }
   0xc   :  { %3831 = shalt.err (!%p3828_p4)
}
   0xd   :  { %s3942_s14 = smov 128   ;;  %s3943_s15 = smov 8  }
   0xe   :  { %41 = dma.hbm_to_vmem [thread:$0]  %s4619_s1, 256, %s36_s10, [#allocation7], %s3942_s14, %s3942_s14, %s3943_s15  }
   0xf   :  { %s3840_s18 = scalar_lea.vmem %s68_s12, 4096  ;;  %p3845_p6 = scmp.lt.s32.totalorder %s68_s12, %s68_s12 }
  0x10   :  { %p3841_p5 = scmp.ne.s32.totalorder %s68_s12, %s3840_s18  ;;  %p3846_p7 = scmp.lt.s32.totalorder %s3840_s18, %s3840_s18 }
  0x12   :  { %p3847_p8 = por %p3846_p7, %p3845_p6 }
  0x14   :  { %p3848_p9 = pnand %p3847_p8, %p3841_p5 }
  0x16   :  { %3851 = shalt.err (!%p3848_p9)
}
  0x17   :  { %s3944_s19 = smov 256   ;;  %s3945_s20 = smov 16  }
  0x18   :  { %73 = dma.hbm_to_vmem [thread:$0]  %s4625_s7, 4096, %s68_s12, [#allocation10], %s3944_s19, %s3944_s19, %s3945_s20  }
  0x19   :  { %s3946_s23 = smov [#allocation3]   ;;  %s3947_s25 = smov [#allocation8]  }
  0x1a   :  { %s23_s24 = sshll.u32 %s3946_s23, 4  ;;  %s55_s26 = sshll.u32 %s3947_s25, 4  ;;  %s24_s24 = int_to_ptr.vmem [resolvable:$true] %s23_s24  ;;  %s56_s26 = int_to_ptr.vmem [resolvable:$true] %s55_s26 }
  0x1b   :  { %s3860_s1 = scalar_lea.vmem %s24_s24, 512  ;;  %p3865_p11 = scmp.lt.s32.totalorder %s24_s24, %s24_s24 }
  0x1c   :  { %p3861_p10 = scmp.ne.s32.totalorder %s24_s24, %s3860_s1  ;;  %p3866_p12 = scmp.lt.s32.totalorder %s3860_s1, %s3860_s1 }
  0x1e   :  { %p3867_p13 = por %p3866_p12, %p3865_p11 }
  0x20   :  { %p3868_p0 = pnand %p3867_p13, %p3861_p10 }
  0x22   :  { %3871 = shalt.err (!%p3868_p0)
}
  0x23   :  { %29 = dma.hbm_to_vmem [thread:$0]  %s4618_s0, 512, %s24_s24, [#allocation4], %s3942_s14, %s3942_s14, %s3943_s15  }
  0x24   :  { %s3880_s7 = scalar_lea.vmem %s56_s26, 2048  ;;  %p3885_p2 = scmp.lt.s32.totalorder %s56_s26, %s56_s26 }
  0x25   :  { %p3881_p1 = scmp.ne.s32.totalorder %s56_s26, %s3880_s7  ;;  %p3886_p3 = scmp.lt.s32.totalorder %s3880_s7, %s3880_s7 }
  0x27   :  { %p3887_p4 = por %p3886_p3, %p3885_p2 }
  0x29   :  { %p3888_p5 = pnand %p3887_p4, %p3881_p1 }
  0x2b   :  { %3891 = shalt.err (!%p3888_p5)
}
  0x2c   :  { %61 = dma.hbm_to_vmem [thread:$0]  %s4624_s6, 2048, %s56_s26, [#allocation7], %s3942_s14, %s3942_s14, %s3943_s15  }
  0x2d   :  { %s3948_s10 = smov [#allocation11]  }
  0x2e   :  { %s79_s11 = sshll.u32 %s3948_s10, 4  ;;  %s80_s11 = int_to_ptr.vmem [resolvable:$true] %s79_s11 }
  0x2f   :  { %s3900_s12 = scalar_lea.vmem %s80_s11, 2048  ;;  %p3905_p7 = scmp.lt.s32.totalorder %s80_s11, %s80_s11 }
  0x30   :  { %p3901_p6 = scmp.ne.s32.totalorder %s80_s11, %s3900_s12  ;;  %p3906_p8 = scmp.lt.s32.totalorder %s3900_s12, %s3900_s12 }
  0x32   :  { %p3907_p9 = por %p3906_p8, %p3905_p7 }
  0x34   :  { %p3908_p10 = pnand %p3907_p9, %p3901_p6 }
  0x36   :  { %3911 = shalt.err (!%p3908_p10)
}
  0x37   :  { %85 = dma.hbm_to_vmem [thread:$0]  %s4626_s8, 2048, %s80_s11, [#allocation10], %s3942_s14, %s3942_s14, %s3943_s15  }
  0x38   :  { %3932 = dma.done.wait [#allocation4], 512  }
  0x39   :  { %3933 = vsyncadd [#allocation4], 4294966784 }
  0x3a   :  { %3934 = dma.done.wait [#allocation7], 2304  }
  0x3b   :  { %3935 = vsyncadd [#allocation7], 4294964992 }
  0x3c   :  { %3936 = dma.done.wait [#allocation10], 6144  }
  0x3d   :  { %3937 = vsyncadd [#allocation10], 4294961152  ;;  %v172_v0 = vld [vmem:[#allocation6] sm:$0xff]  ;;  %v173_v2 = vld [vmem:[#allocation6 + $0x8] sm:$0xff]  ;;  %vm3950_vm0 = vmmov 0   ;;  %vm503_vm1 = vcmask 261120  }
  0x3e   :  { %v101_v1 = vld [vmem:[#allocation3] sm:$0xff]  ;;  %176 = vadd.xlane.f32.xlu0 %v172_v0  ;;  %v102_v3 = vld [vmem:[#allocation3 + $0x8] sm:$0xff]  ;;  %v103_v4 = vld [vmem:[#allocation3 + $0x10] sm:$0xff]  ;;  %vm808_vm2 = vcmask 130048   ;;  %vm815_vm3 = vcmask 64512   ;;  %vm1828_vm4 = vcmask 523520  }
  0x3f   :  { %107 = vadd.xlane.f32.xlu1 %v101_v1  ;;  %v104_v5 = vld [vmem:[#allocation3 + $0x18] sm:$0xff]  ;;  %v229_v6 = vld [vmem:[#allocation8 + $0x78] sm:$0xff]  ;;  %v228_v8 = vld [vmem:[#allocation8 + $0x70] sm:$0xff]  ;;  %vm2505_vm5 = vcmask 785920   ;;  %vm3182_vm6 = vcmask 1048320   ;;  %s3954_s21 = smov [#allocation12]  }
  0x40   :  { %v4032_v7 = vld [vmem:[#allocation9 + $0xf8] sm:$0xff]  ;;  %3475 = vmatprep.subr.mxu0 %v229_v6  ;;  %v4035_v9 = vld [vmem:[#allocation9 + $0xf0] sm:$0xff]  ;;  %v4037_v10 = vld [vmem:[#allocation9 + $0xe8] sm:$0xff]  ;;  %s3285_s22 = sshll.u32 %s3954_s21, 4  ;;  %s3286_s22 = int_to_ptr.vmem [resolvable:$true] %s3285_s22 }
  0x41   :  { %337 = vmatprep.subr.mxu1 %v4032_v7  ;;  %3476 = vmatpush3.msra.mxu0 %v229_v6  ;;  %v227_v11 = vld [vmem:[#allocation8 + $0x68] sm:$0xff]  ;;  %v4040_v12 = vld [vmem:[#allocation9 + $0xe0] sm:$0xff]  ;;  %v4068_v37 = vld [vmem:[#allocation9 + $0xd8] sm:$0xff]  ;;  %s3912_s23 = scalar_lea.vmem %s3286_s22, 256  ;;  %p3917_p12 = scmp.lt.s32.totalorder %s3286_s22, %s3286_s22 }
  0x42   :  { %178 = vadd.xlane.f32.xlu0 %v173_v2  ;;  %338 = vmatpush1.msra.mxu1 %v4035_v9  ;;  %v226_v38 = vld [vmem:[#allocation8 + $0x60] sm:$0xff]  ;;  %v4071_v39 = vld [vmem:[#allocation9 + $0xd0] sm:$0xff]  ;;  %v4074_v40 = vld [vmem:[#allocation9 + $0xc8] sm:$0xff]  ;;  %p3913_p11 = scmp.ne.s32.totalorder %s3286_s22, %s3912_s23  ;;  %p3918_p13 = scmp.lt.s32.totalorder %s3912_s23, %s3912_s23 }
  0x43   :  { %109 = vadd.xlane.f32.xlu1 %v102_v3  ;;  %3477 = vmatprep.subr.mxu0 %v228_v8  ;;  %v225_v41 = vld [vmem:[#allocation8 + $0x58] sm:$0xff]  ;;  %v4076_v42 = vld [vmem:[#allocation9 + $0xc0] sm:$0xff]  ;;  %v224_v44 = vld [vmem:[#allocation8 + $0x50] sm:$0xff] }
  0x44   :  { %339 = vmatprep.subr.mxu1 %v4037_v10  ;;  %3478 = vmatpush3.msra.mxu0 %v228_v8  ;;  %v4080_v43 = vld [vmem:[#allocation9 + $0xb8] sm:$0xff]  ;;  %v4083_v45 = vld [vmem:[#allocation9 + $0xb0] sm:$0xff]  ;;  %v4086_v46 = vld [vmem:[#allocation9 + $0xa8] sm:$0xff]  ;;  %p3919_p0 = por %p3918_p13, %p3917_p12 }
  0x45   :  { %340 = vmatpush1.msra.mxu1 %v4040_v12  ;;  %3479 = vmatprep.subr.mxu0 %v227_v11  ;;  %v223_v47 = vld [vmem:[#allocation8 + $0x48] sm:$0xff]  ;;  %v4089_v48 = vld [vmem:[#allocation9 + $0xa0] sm:$0xff]  ;;  %v4092_v49 = vld [vmem:[#allocation9 + $0x98] sm:$0xff] }
  0x46   :  { %111 = vadd.xlane.f32.xlu0 %v103_v4  ;;  %3480 = vmatpush3.msra.mxu0 %v227_v11  ;;  %v222_v50 = vld [vmem:[#allocation8 + $0x40] sm:$0xff]  ;;  %v4095_v51 = vld [vmem:[#allocation9 + $0x90] sm:$0xff]  ;;  %v4098_v52 = vld [vmem:[#allocation9 + $0x88] sm:$0xff]  ;;  %p3920_p1 = pnand %p3919_p0, %p3913_p11 }
  0x47   :  { %113 = vadd.xlane.f32.xlu1 %v104_v5  ;;  %341 = vmatprep.subr.mxu1 %v4068_v37  ;;  %v221_v53 = vld [vmem:[#allocation8 + $0x38] sm:$0xff]  ;;  %v4101_v54 = vld [vmem:[#allocation9 + $0x80] sm:$0xff]  ;;  %v220_v56 = vld [vmem:[#allocation8 + $0x30] sm:$0xff] }
  0x48   :  { %3481 = vmatprep.subr.mxu0 %v226_v38  ;;  %342 = vmatpush1.msra.mxu1 %v4071_v39  ;;  %v4104_v55 = vld [vmem:[#allocation9 + $0x78] sm:$0xff]  ;;  %v4107_v57 = vld [vmem:[#allocation9 + $0x70] sm:$0xff]  ;;  %v4110_v58 = vld [vmem:[#allocation9 + $0x68] sm:$0xff] }
  0x49   :  { %3482 = vmatpush3.msra.mxu0 %v226_v38  ;;  %343 = vmatprep.subr.mxu1 %v4074_v40  ;;  %v219_v59 = vld [vmem:[#allocation8 + $0x28] sm:$0xff]  ;;  %v4113_v60 = vld [vmem:[#allocation9 + $0x60] sm:$0xff]  ;;  %v4116_v61 = vld [vmem:[#allocation9 + $0x58] sm:$0xff] }
  0x4a   :  { %3483 = vmatprep.subr.mxu0 %v225_v41  ;;  %344 = vmatpush1.msra.mxu1 %v4076_v42  ;;  %v218_v62 = vld [vmem:[#allocation8 + $0x20] sm:$0xff]  ;;  %v4118_v63 = vld [vmem:[#allocation9 + $0x50] sm:$0xff]  ;;  %v4132_v6 = vld [vmem:[#allocation9 + $0x28] sm:$0xff] }
  0x4b   :  { %3484 = vmatpush3.msra.mxu0 %v225_v41  ;;  %345 = vmatprep.subr.mxu1 %v4080_v43  ;;  %v215_v8 = vld [vmem:[#allocation8 + $0x8] sm:$0xff]  ;;  %v4135_v11 = vld [vmem:[#allocation9 + $0x20] sm:$0xff] }
  0x4c   :  { %3485 = vmatprep.subr.mxu0 %v224_v44  ;;  %346 = vmatpush1.msra.mxu1 %v4083_v45 }
  0x4d   :  { %3486 = vmatpush3.msra.mxu0 %v224_v44  ;;  %347 = vmatprep.subr.mxu1 %v4086_v46 }
  0x4e   :  { %3487 = vmatprep.subr.mxu0 %v223_v47  ;;  %348 = vmatpush1.msra.mxu1 %v4089_v48 }
  0x4f   :  { %3488 = vmatpush3.msra.mxu0 %v223_v47  ;;  %349 = vmatprep.subr.mxu1 %v4092_v49 }
  0x50   :  { %3489 = vmatprep.subr.mxu0 %v222_v50  ;;  %350 = vmatpush1.msra.mxu1 %v4095_v51 }
  0x51   :  { %3490 = vmatpush3.msra.mxu0 %v222_v50  ;;  %351 = vmatprep.subr.mxu1 %v4098_v52 }
  0x52   :  { %3491 = vmatprep.subr.mxu0 %v221_v53  ;;  %352 = vmatpush1.msra.mxu1 %v4101_v54 }
  0x53   :  { %3492 = vmatpush3.msra.mxu0 %v221_v53  ;;  %353 = vmatprep.subr.mxu1 %v4104_v55 }
  0x54   :  { %3493 = vmatprep.subr.mxu0 %v220_v56  ;;  %354 = vmatpush1.msra.mxu1 %v4107_v57 }
  0x55   :  { %3494 = vmatpush3.msra.mxu0 %v220_v56  ;;  %355 = vmatprep.subr.mxu1 %v4110_v58  ;;  %v3301_v56 = vld [vmem:[%s4622_s4] ss:$0 sm:$0xff] }
  0x56   :  { %3495 = vmatprep.subr.mxu0 %v219_v59  ;;  %356 = vmatpush1.msra.mxu1 %v4113_v60 }
  0x57   :  { %3496 = vmatpush3.msra.mxu0 %v219_v59  ;;  %357 = vmatprep.subr.mxu1 %v4116_v61 }
  0x58   :  { %3497 = vmatprep.subr.mxu0 %v218_v62  ;;  %358 = vmatpush1.msra.mxu1 %v4118_v63 }
  0x59   :  { %3498 = vmatpush3.msra.mxu0 %v218_v62  ;;  %v3302_v62 = vld [vmem:[%s4623_s5] ss:$0 sm:$0xff]  ;;  %s3953_s5 = smov 32  }
  0xc7   :  { %v177_v13 = vpop.xlane.xlu0 %176 }
  0xc8   :  { %v108_v14 = vpop.xlane.xlu1 %107  ;;  %v180_v15 = vmul.f32 0.0078125, %v177_v13  ;;  %v4140_v13 = vld [vmem:[#allocation9 + $0x18] sm:$0xff] }
  0xc9   :  { %v116_v16 = vmul.f32 0.0078125, %v108_v14  ;;  %v214_v14 = vld [vmem:[#allocation8] sm:$0xff] }
  0xca   :  { %v4044_v17 = vsub.f32 %v172_v0, %v180_v15  ;;  %v4121_v0 = vld [vmem:[#allocation9 + $0x48] sm:$0xff]  ;;  %v4143_v15 = vld [vmem:[#allocation9 + $0x10] sm:$0xff] }
  0xcb   :  { %v4046_v18 = vsub.f32 %v101_v1, %v116_v16  ;;  %v179_v19 = vpop.xlane.xlu0 %178  ;;  %v217_v1 = vld [vmem:[#allocation8 + $0x18] sm:$0xff]  ;;  %359 = vmatprep.subr.mxu1 %v4121_v0  ;;  %v4146_v16 = vld [vmem:[#allocation9 + $0x8] sm:$0xff] }
  0xcc   :  { %v110_v20 = vpop.xlane.xlu1 %109  ;;  %v181_v21 = vmul.f32 0.0078125, %v179_v19  ;;  %v184_v22 = vmul.f32 %v4044_v17, %v4044_v17  ;;  %3499 = vmatprep.subr.mxu0 %v217_v1  ;;  %v4149_v19 = vld [vmem:[#allocation9] sm:$0xff] }
  0xcd   :  { %v117_v23 = vmul.f32 0.0078125, %v110_v20  ;;  %v124_v26 = vmul.f32 %v4046_v18, %v4046_v18  ;;  %3500 = vmatpush3.msra.mxu0 %v217_v1  ;;  %v3949_v20 = vmov 0.0  }
  0xce   :  { %v4050_v24 = vsub.f32 %v173_v2, %v181_v21  ;;  %186 = vadd.xlane.f32.xlu0 %v184_v22  ;;  %v4123_v2 = vld [vmem:[#allocation9 + $0x40] sm:$0xff]  ;;  %401 = vmatprep.mubr.f32.mxu1 %v3949_v20 }
  0xcf   :  { %v4052_v25 = vsub.f32 %v102_v3, %v117_v23  ;;  %v112_v27 = vpop.xlane.xlu0 %111  ;;  %v4126_v3 = vld [vmem:[#allocation9 + $0x38] sm:$0xff]  ;;  %360 = vmatpush1.msra.mxu1 %v4123_v2 }
  0xd0   :  { %v114_v28 = vpop.xlane.xlu1 %113  ;;  %v118_v29 = vmul.f32 0.0078125, %v112_v27  ;;  %v185_v30 = vmul.f32 %v4050_v24, %v4050_v24  ;;  %361 = vmatprep.subr.mxu1 %v4126_v3 }
  0xd1   :  { %v119_v31 = vmul.f32 0.0078125, %v114_v28  ;;  %v125_v34 = vmul.f32 %v4052_v25, %v4052_v25 }
  0xd2   :  { %v4058_v32 = vsub.f32 %v103_v4, %v118_v29  ;;  %188 = vadd.xlane.f32.xlu1 %v185_v30  ;;  %128 = vadd.xlane.f32.xlu0 %v124_v26  ;;  %v216_v4 = vld [vmem:[#allocation8 + $0x10] sm:$0xff] }
  0xd3   :  { %v4060_v33 = vsub.f32 %v104_v5, %v119_v31  ;;  %v4129_v5 = vld [vmem:[#allocation9 + $0x30] sm:$0xff]  ;;  %3501 = vmatprep.subr.mxu0 %v216_v4 }
  0xd4   :  { %v126_v35 = vmul.f32 %v4058_v32, %v4058_v32  ;;  %362 = vmatpush1.msra.mxu1 %v4129_v5  ;;  %3502 = vmatpush3.msra.mxu0 %v216_v4 }
  0xd5   :  { %v127_v36 = vmul.f32 %v4060_v33, %v4060_v33  ;;  %363 = vmatprep.subr.mxu1 %v4132_v6  ;;  %3503 = vmatprep.subr.mxu0 %v215_v8 }
  0xd6   :  { %132 = vadd.xlane.f32.xlu0 %v126_v35  ;;  %130 = vadd.xlane.f32.xlu1 %v125_v34 }
  0xd7   :  { %364 = vmatpush1.msra.mxu1 %v4135_v11  ;;  %3504 = vmatpush3.msra.mxu0 %v215_v8  ;;  %v3299_v8 = vld [vmem:[%s4620_s2] ss:$0 sm:$0xff]  ;;  %s3951_s2 = smov 96  }
  0xd8   :  { %365 = vmatprep.subr.mxu1 %v4140_v13  ;;  %3505 = vmatprep.subr.mxu0 %v214_v14 }
  0xd9   :  { %366 = vmatpush1.msra.mxu1 %v4143_v15  ;;  %3506 = vmatpush3.msra.mxu0 %v214_v14 }
  0xda   :  { %134 = vadd.xlane.f32.xlu1 %v127_v36  ;;  %367 = vmatprep.subr.mxu1 %v4146_v16 }
  0xdb   :  { %368 = vmatpush1.msra.mxu1 %v4149_v19  ;;  %426 = vmatprep.subr.mxu0 %v4032_v7 }
  0xdc   :  { %3517 = vmatprep.subr.mxu1 %v3949_v20 }
 0x157   :  { %v187_v21 = vpop.xlane.xlu0 %186 }
 0x158   :  { %v190_v22 = vmul.f32 0.0078125, %v187_v21 }
 0x15a   :  { %v192_v23 = vadd.f32 1e-05, %v190_v22 }
 0x15b   :  { %v129_v26 = vpop.xlane.xlu0 %128  ;;  %v189_v27 = vpop.xlane.xlu1 %188 }
 0x15c   :  { %3752 = vrsqrt.f32 %v192_v23  ;;  %v136_v28 = vmul.f32 0.0078125, %v129_v26  ;;  %v191_v29 = vmul.f32 0.0078125, %v189_v27 }
 0x15e   :  { %v140_v30 = vadd.f32 1e-05, %v136_v28  ;;  %v193_v31 = vadd.f32 1e-05, %v191_v29 }
 0x15f   :  { %v133_v34 = vpop.xlane.xlu0 %132  ;;  %v131_v35 = vpop.xlane.xlu1 %130 }
 0x160   :  { %3754 = vrsqrt.f32 %v140_v30  ;;  %v138_v36 = vmul.f32 0.0078125, %v133_v34  ;;  %v137_v38 = vmul.f32 0.0078125, %v131_v35 }
 0x161   :  { %3756 = vrsqrt.f32 %v193_v31 }
 0x162   :  { %v142_v41 = vadd.f32 1e-05, %v138_v36  ;;  %v141_v7 = vadd.f32 1e-05, %v137_v38 }
 0x163   :  { %v135_v44 = vpop.xlane.xlu1 %134 }
 0x164   :  { %3758 = vrsqrt.f32 %v142_v41  ;;  %v139_v47 = vmul.f32 0.0078125, %v135_v44 }
 0x165   :  { %3760 = vrsqrt.f32 %v141_v7 }
 0x166   :  { %v143_v50 = vadd.f32 1e-05, %v139_v47 }
 0x168   :  { %3762 = vrsqrt.f32 %v143_v50 }
 0x169   :  { %v3753_v53 = vpop.eup %3752 }
 0x16a   :  { %v196_v59 = vmul.f32 %v3753_v53, %v4044_v17  ;;  %v3300_v17 = vld [vmem:[%s4621_s3] ss:$0 sm:$0xff]  ;;  %s3952_s3 = smov 64  }
 0x16c   :  { %v204_v1 = vmul.f32 %v3301_v56, %v196_v59 }
 0x16d   :  { %v3755_v4 = vpop.eup %3754 }
 0x16e   :  { %v3757_v14 = vpop.eup %3756  ;;  %v212_v21 = vadd.f32 %v3302_v62, %v204_v1  ;;  %v148_v22 = vmul.f32 %v3755_v4, %v4046_v18 }
 0x16f   :  { %v197_v23 = vmul.f32 %v3757_v14, %v4050_v24 }
 0x170   :  { %3507 = vmatprep.mubr.f32.mxu0 %v212_v21  ;;  %v158_v26 = vmul.f32 %v3299_v8, %v148_v22 }
 0x171   :  { %v3759_v27 = vpop.eup %3758  ;;  %v205_v28 = vmul.f32 %v3301_v56, %v197_v23 }
 0x172   :  { %v3761_v29 = vpop.eup %3760  ;;  %v168_v30 = vadd.f32 %v3300_v17, %v158_v26  ;;  %v150_v35 = vmul.f32 %v3759_v27, %v4058_v32 }
 0x173   :  { %v213_v31 = vadd.f32 %v3302_v62, %v205_v28  ;;  %v149_v34 = vmul.f32 %v3761_v29, %v4052_v25 }
 0x174   :  { %402 = vmatmul.mubr.f32.vlgmr.msra.gmra.mxu1 %v168_v30  ;;  %v160_v38 = vmul.f32 %v3299_v8, %v150_v35 }
 0x175   :  { %v3763_v36 = vpop.eup %3762  ;;  %3508 = vmatmul.mubr.f32.vlgmr.msra.gmra.mxu0 %v213_v31  ;;  %407 = vmatprep.mubr.f32.mxu1 %v3949_v20  ;;  %v159_v18 = vmul.f32 %v3299_v8, %v149_v34 }
 0x176   :  { %427 = vmatpush1.msra.mxu0 %v4035_v9  ;;  %490 = vmatprep.mubr.f32.mxu0 %v3949_v20  ;;  %v151_v41 = vmul.f32 %v3763_v36, %v4060_v33  ;;  %v170_v9 = vadd.f32 %v3300_v17, %v160_v38 }
 0x177   :  { %428 = vmatprep.subr.mxu0 %v4037_v10  ;;  %v169_v24 = vadd.f32 %v3300_v17, %v159_v18 }
 0x178   :  { %429 = vmatpush1.msra.mxu0 %v4040_v12  ;;  %v161_v25 = vmul.f32 %v3299_v8, %v151_v41 }
 0x179   :  { %430 = vmatprep.subr.mxu0 %v4068_v37  ;;  %408 = vmatmul.mubr.f32.gmra.mxu1 %v169_v24 }
 0x17a   :  { %431 = vmatpush1.msra.mxu0 %v4071_v39  ;;  %413 = vmatprep.mubr.f32.mxu1 %v3949_v20  ;;  %v171_v10 = vadd.f32 %v3300_v17, %v161_v25 }
 0x17b   :  { %432 = vmatprep.subr.mxu0 %v4074_v40 }
 0x17c   :  { %433 = vmatpush1.msra.mxu0 %v4076_v42 }
 0x17d   :  { %434 = vmatprep.subr.mxu0 %v4080_v43  ;;  %414 = vmatmul.mubr.f32.gmra.mxu1 %v170_v9 }
 0x17e   :  { %435 = vmatpush1.msra.mxu0 %v4083_v45  ;;  %419 = vmatprep.mubr.f32.mxu1 %v3949_v20 }
 0x17f   :  { %436 = vmatprep.subr.mxu0 %v4086_v46 }
 0x180   :  { %437 = vmatpush1.msra.mxu0 %v4089_v48 }
 0x181   :  { %438 = vmatprep.subr.mxu0 %v4092_v49  ;;  %420 = vmatmul.mubr.f32.gmra.mxu1 %v171_v10 }
 0x182   :  { %439 = vmatpush1.msra.mxu0 %v4095_v51  ;;  %3521 = vmatprep.mubr.msk.f32.mxu1 %vm3950_vm0, %v3949_v20 }
 0x183   :  { %440 = vmatprep.subr.mxu0 %v4098_v52 }
 0x184   :  { %441 = vmatpush1.msra.mxu0 %v4101_v54 }
 0x185   :  { %442 = vmatprep.subr.mxu0 %v4104_v55 }
 0x186   :  { %443 = vmatpush1.msra.mxu0 %v4107_v57 }
 0x187   :  { %444 = vmatprep.subr.mxu0 %v4110_v58 }
 0x188   :  { %445 = vmatpush1.msra.mxu0 %v4113_v60 }
 0x189   :  { %446 = vmatprep.subr.mxu0 %v4116_v61 }
 0x18a   :  { %447 = vmatpush1.msra.mxu0 %v4118_v63 }
 0x18b   :  { %448 = vmatprep.subr.mxu0 %v4121_v0 }
 0x18c   :  { %449 = vmatpush1.msra.mxu0 %v4123_v2 }
 0x18d   :  { %450 = vmatprep.subr.mxu0 %v4126_v3 }
 0x18e   :  { %451 = vmatpush1.msra.mxu0 %v4129_v5 }
 0x18f   :  { %452 = vmatprep.subr.mxu0 %v4132_v6 }
 0x190   :  { %453 = vmatpush1.msra.mxu0 %v4135_v11 }
 0x191   :  { %454 = vmatprep.subr.mxu0 %v4140_v13 }
 0x192   :  { %455 = vmatpush1.msra.mxu0 %v4143_v15 }
 0x193   :  { %456 = vmatprep.subr.mxu0 %v4146_v16 }
 0x194   :  { %457 = vmatpush1.msra.mxu0 %v4149_v19 }
 0x195   :  { %491 = vmatmul.mubr.f32.vlgmr.msra.gmra.mxu0 %v212_v21  ;;  %3510 = vmatprep.subr.mxu0 %v3949_v20 }
 0x196   :  { %496 = vmatprep.mubr.f32.mxu0 %v3949_v20 }
 0x199   :  { %497 = vmatmul.mubr.f32.gmra.mxu0 %v213_v31 }
 0x19a   :  { %3514 = vmatprep.mubr.msk.f32.mxu0 %vm3950_vm0, %v3949_v20 }
 0x234   :  { %v4214_v12 = vpop.f32.mrf.mxu1 }
 0x235   :  { %v4225_v39 = vpop.f32.mrf.mxu0 }
 0x236   :  { %v4216_v32 = vpop.f32.mrf.mxu1 }
 0x237   :  { %v4234_v43 = vpop.f32.mrf.mxu0 }
 0x239   :  { %v4218_v33 = vpop.f32.mrf.mxu1 }
 0x23a   :  { %3511 = vmatpush3.xpose.msk.msra.mxu0 %vm503_vm1, %v4218_v33 }
 0x23b   :  { %v4222_v37 = vpop.f32.mrf.mxu1  ;;  %3512 = vmatprep.subr.mxu0 %v3949_v20 }
 0x23d   :  { %v4227_v40 = vpop.f32.mrf.mxu1 }
 0x23e   :  { %3513 = vmatpush3.xpose.msk.msra.mxu0 %vm503_vm1, %v4214_v12 }
 0x23f   :  { %v4231_v42 = vpop.f32.mrf.mxu1  ;;  %3539 = vmatprep.subr.mxu0 %v3949_v20 }
 0x241   :  { %v4236_v45 = vpop.f32.mrf.mxu1  ;;  %3515 = vmatmul.mubr.msk.f32.vlgmr.msra.gmra.mxu0 %vm503_vm1, %v4234_v43 }
 0x242   :  { %3518 = vmatpush3.xpose.msk.msra.mxu1 %vm503_vm1, %v4236_v45  ;;  %3541 = vmatprep.mubr.msk.f32.mxu0 %vm3950_vm0, %v3949_v20 }
 0x243   :  { %3519 = vmatprep.subr.mxu1 %v3949_v20  ;;  %v4278_v55 = vpop.f32.mrf.mxu1 }
 0x246   :  { %3520 = vmatpush3.xpose.msk.msra.mxu1 %vm503_vm1, %v4227_v40 }
 0x247   :  { %3524 = vmatprep.subr.mxu1 %v3949_v20 }
 0x249   :  { %3522 = vmatmul.mubr.msk.f32.vlgmr.msra.gmra.mxu1 %vm503_vm1, %v4225_v39 }
 0x24a   :  { %3526 = vmatprep.mubr.msk.f32.mxu1 %vm3950_vm0, %v3949_v20 }
 0x255   :  { %v4252_v46 = vpop.f32.mrf.mxu0 }
 0x256   :  { %3525 = vmatpush3.xpose.msk.msra.mxu1 %vm503_vm1, %v4252_v46 }
 0x257   :  { %v4256_v48 = vpop.f32.mrf.mxu0  ;;  %3529 = vmatprep.subr.mxu1 %v3949_v20 }
 0x259   :  { %v4259_v49 = vpop.f32.mrf.mxu0  ;;  %3527 = vmatmul.mubr.msk.f32.vlgmr.msra.gmra.mxu1 %vm503_vm1, %v4234_v43 }
 0x25a   :  { %3530 = vmatpush3.xpose.msk.msra.mxu1 %vm503_vm1, %v4259_v49  ;;  %3531 = vmatprep.mubr.msk.f32.mxu1 %vm3950_vm0, %v3949_v20 }
 0x25b   :  { %v4267_v51 = vpop.f32.mrf.mxu0  ;;  %3534 = vmatprep.subr.mxu1 %v3949_v20 }
 0x25c   :  { %3540 = vmatpush3.msra.mxu0 %v4267_v51 }
 0x25d   :  { %3532 = vmatmul.mubr.msk.f32.vlgmr.msra.gmra.mxu1 %vm503_vm1, %v4225_v39  ;;  %3551 = vmatprep.subr.mxu0 %v3949_v20 }
 0x25e   :  { %3535 = vmatpush3.msra.mxu1 %v4256_v48  ;;  %3536 = vmatprep.mubr.msk.f32.mxu1 %vm3950_vm0, %v3949_v20 }
 0x25f   :  { %3544 = vmatprep.subr.mxu1 %v3949_v20 }
 0x301   :  { %v579_v52 = vpop.f32.mrf.mxu0 }
 0x302   :  { %v809_v61 = vsel %vm808_vm2, %v579_v52, -inf }
 0x303   :  { %v3516_v54 = vpop.f32.mrf.mxu0 }
 0x309   :  { %v658_v57 = vpop.f32.mrf.mxu1 }
 0x30a   :  { %v812_v58 = vsel %vm808_vm2, %v658_v57, -inf }
 0x30b   :  { %813 = vmax.xlane.f32.xlu0 %v812_v58  ;;  %v3523_v60 = vpop.f32.mrf.mxu1 }
 0x30f   :  { %810 = vmax.xlane.f32.xlu0 %v809_v61 }
 0x319   :  { %v731_v63 = vpop.f32.mrf.mxu1 }
 0x31a   :  { %v816_v0 = vsel %vm815_vm3, %v731_v63, -inf }
 0x31b   :  { %817 = vmax.xlane.f32.xlu1 %v816_v0  ;;  %v3528_v2 = vpop.f32.mrf.mxu1 }
 0x31d   :  { %v804_v3 = vpop.f32.mrf.mxu1 }
 0x31e   :  { %v819_v5 = vsel %vm815_vm3, %v804_v3, -inf }
 0x31f   :  { %820 = vmax.xlane.f32.xlu1 %v819_v5  ;;  %v3533_v6 = vpop.f32.mrf.mxu1 }
 0x325   :  { %1152 = vrot.lane.b32.xlu0 %v4218_v33, %s3951_s2 }
 0x329   :  { %1232 = vrot.lane.b32.xlu0 %v4227_v40, %s3951_s2 }
 0x32d   :  { %1312 = vrot.lane.b32.xlu0 %v4252_v46, %s3951_s2 }
 0x330   :  { %1150 = vrot.lane.b32.xlu1 %v4214_v12, %s3951_s2 }
 0x331   :  { %1501 = vrot.lane.b32.xlu0 %v4256_v48, %s3951_s2 }
 0x334   :  { %1148 = vrot.lane.b32.xlu1 %v4234_v43, %s3951_s2 }
 0x335   :  { %1656 = vrot.lane.b32.xlu0 %v4216_v32, %s3951_s2 }
 0x338   :  { %1234 = vrot.lane.b32.xlu1 %v4236_v45, %s3951_s2 }
 0x33c   :  { %1230 = vrot.lane.b32.xlu1 %v4225_v39, %s3951_s2 }
 0x340   :  { %1386 = vrot.lane.b32.xlu1 %v4259_v49, %s3951_s2 }
 0x344   :  { %1578 = vrot.lane.b32.xlu1 %v4267_v51, %s3951_s2 }
 0x348   :  { %1658 = vrot.lane.b32.xlu1 %v4222_v37, %s3951_s2 }
 0x34c   :  { %1739 = vrot.lane.b32.xlu1 %v4278_v55, %s3951_s2 }
 0x350   :  { %1737 = vrot.lane.b32.xlu1 %v4231_v42, %s3951_s2 }
 0x394   :  { %v814_v11 = vpop.xlane.xlu0 %813 }
 0x398   :  { %v811_v13 = vpop.xlane.xlu0 %810 }
 0x39c   :  { %v1153_v4 = vpop.permute.xlu0 %1152 }
 0x3a0   :  { %v1233_v8 = vpop.permute.xlu0 %1232 }
 0x3a4   :  { %v818_v15 = vpop.xlane.xlu1 %817  ;;  %v1313_v17 = vpop.permute.xlu0 %1312 }
 0x3a5   :  { %v822_v16 = vmax.f32 %v811_v13, %v818_v15 }
 0x3a7   :  { %v830_v19 = vsub.f32 %v731_v63, %v822_v16  ;;  %v824_v44 = vsub.f32 %v579_v52, %v822_v16 }
 0x3a8   :  { %v821_v7 = vpop.xlane.xlu1 %820  ;;  %v1502_v28 = vpop.permute.xlu0 %1501 }
 0x3a9   :  { %v832_v47 = vmul.f32 1.442695, %v830_v19  ;;  %v823_v50 = vmax.f32 %v814_v11, %v821_v7  ;;  %v826_v56 = vmul.f32 1.442695, %v824_v44 }
 0x3ab   :  { %v831_v53 = vsub.f32 %v804_v3, %v823_v50  ;;  %3764 = vpow2.f32 %v832_v47  ;;  %v825_v59 = vsub.f32 %v658_v57, %v823_v50 }
 0x3ac   :  { %v1151_v21 = vpop.permute.xlu1 %1150  ;;  %v1657_v16 = vpop.permute.xlu0 %1656 }
 0x3ad   :  { %v834_v62 = vmul.f32 1.442695, %v831_v53  ;;  %v828_v1 = vmul.f32 1.442695, %v825_v59 }
 0x3af   :  { %3766 = vpow2.f32 %v834_v62 }
 0x3b0   :  { %3768 = vpow2.f32 %v826_v56  ;;  %v1149_v26 = vpop.permute.xlu1 %1148 }
 0x3b1   :  { %3770 = vpow2.f32 %v828_v1 }
 0x3b4   :  { %v1235_v29 = vpop.permute.xlu1 %1234 }
 0x3b8   :  { %v4312_v14 = vpop.eup %3764  ;;  %v1231_v30 = vpop.permute.xlu1 %1230 }
 0x3b9   :  { %3537 = vmatmul.mubr.msk.f32.vlgmr.msra.gmra.mxu1 %vm815_vm3, %v4312_v14 }
 0x3ba   :  { %3545 = vmatpush3.msra.mxu1 %v4222_v37  ;;  %3548 = vmatprep.mubr.msk.f32.mxu1 %vm3950_vm0, %v3949_v20 }
 0x3bb   :  { %3546 = vmatprep.subr.mxu1 %v3949_v20 }
 0x3bc   :  { %v4320_v22 = vpop.eup %3766  ;;  %3547 = vmatpush3.msra.mxu1 %v4216_v32  ;;  %v1387_v31 = vpop.permute.xlu1 %1386 }
 0x3bd   :  { %v4323_v23 = vpop.eup %3768  ;;  %3572 = vmatprep.subr.mxu1 %v3949_v20  ;;  %3542 = vmatmul.mubr.msk.f32.vlgmr.msra.gmra.mxu0 %vm815_vm3, %v4320_v22 }
 0x3be   :  { %3549 = vmatmul.mubr.msk.f32.vlgmr.msra.gmra.mxu1 %vm808_vm2, %v4323_v23  ;;  %3552 = vmatpush3.msra.mxu0 %v4278_v55  ;;  %v4336_v27 = vpop.eup %3770 }
 0x3bf   :  { %3573 = vmatpush3.xpose.msk.msra.mxu1 %vm503_vm1, %v1313_v17  ;;  %3553 = vmatprep.subr.mxu0 %v3949_v20 }
 0x3c0   :  { %3554 = vmatpush3.msra.mxu0 %v4231_v42  ;;  %3555 = vmatprep.mubr.msk.f32.mxu0 %vm3950_vm0, %v3949_v20  ;;  %v1579_v34 = vpop.permute.xlu1 %1578 }
 0x3c1   :  { %3558 = vmatprep.subr.mxu0 %v3949_v20  ;;  %3574 = vmatprep.mubr.msk.f32.mxu1 %vm3950_vm0, %v3949_v20 }
 0x3c2   :  { %3582 = vmatprep.subr.mxu1 %v3949_v20  ;;  %3556 = vmatmul.mubr.msk.f32.vlgmr.msra.gmra.mxu0 %vm808_vm2, %v4336_v27 }
 0x3c3   :  { %3559 = vmatpush3.xpose.msk.msra.mxu0 %vm503_vm1, %v1153_v4  ;;  %3575 = vmatmul.mubr.msk.f32.vlgmr.msra.gmra.mxu1 %vm503_vm1, %v1149_v26 }
 0x3c4   :  { %3583 = vmatpush3.msra.mxu1 %v1502_v28  ;;  %3560 = vmatprep.subr.mxu0 %v3949_v20  ;;  %v1659_v13 = vpop.permute.xlu1 %1658 }
 0x3c5   :  { %3562 = vmatprep.mubr.msk.f32.mxu0 %vm3950_vm0, %v3949_v20  ;;  %3584 = vmatprep.mubr.msk.f32.mxu1 %vm3950_vm0, %v3949_v20 }
 0x3c6   :  { %3592 = vmatprep.subr.mxu1 %v3949_v20 }
 0x3c7   :  { %3561 = vmatpush3.xpose.msk.msra.mxu0 %vm503_vm1, %v1151_v21 }
 0x3c8   :  { %3565 = vmatprep.subr.mxu0 %v3949_v20  ;;  %v1740_v15 = vpop.permute.xlu1 %1739 }
 0x3ca   :  { %3563 = vmatmul.mubr.msk.f32.vlgmr.msra.gmra.mxu0 %vm503_vm1, %v1149_v26 }
 0x3cb   :  { %3566 = vmatpush3.xpose.msk.msra.mxu0 %vm503_vm1, %v1235_v29  ;;  %3569 = vmatprep.mubr.msk.f32.mxu0 %vm3950_vm0, %v3949_v20 }
 0x3cc   :  { %3567 = vmatprep.subr.mxu0 %v3949_v20  ;;  %v1738_v19 = vpop.permute.xlu1 %1737 }
 0x3cf   :  { %3568 = vmatpush3.xpose.msk.msra.mxu0 %vm503_vm1, %v1233_v8 }
 0x3d0   :  { %3577 = vmatprep.subr.mxu0 %v3949_v20 }
 0x3d2   :  { %3570 = vmatmul.mubr.msk.f32.vlgmr.msra.gmra.mxu0 %vm503_vm1, %v1231_v30 }
 0x3d3   :  { %3578 = vmatpush3.xpose.msk.msra.mxu0 %vm503_vm1, %v1387_v31  ;;  %3579 = vmatprep.mubr.msk.f32.mxu0 %vm3950_vm0, %v3949_v20 }
 0x3d4   :  { %3587 = vmatprep.subr.mxu0 %v3949_v20 }
 0x3d6   :  { %3580 = vmatmul.mubr.msk.f32.vlgmr.msra.gmra.mxu0 %vm503_vm1, %v1231_v30 }
 0x3d7   :  { %3588 = vmatpush3.msra.mxu0 %v1579_v34  ;;  %3589 = vmatprep.mubr.msk.f32.mxu0 %vm3950_vm0, %v3949_v20 }
 0x3d8   :  { %3599 = vmatprep.subr.mxu0 %v3949_v20 }
 0x479   :  { %v919_v35 = vpop.f32.mrf.mxu1 }
 0x47b   :  { %v3538_v36 = vpop.f32.mrf.mxu1 }
 0x47d   :  { %v992_v18 = vpop.f32.mrf.mxu0 }
 0x47e   :  { %v1065_v24 = vpop.f32.mrf.mxu1 }
 0x47f   :  { %v4370_v38 = vadd.f32 %v1065_v24, %v919_v35  ;;  %v3543_v41 = vpop.f32.mrf.mxu0 }
 0x480   :  { %v3550_v9 = vpop.f32.mrf.mxu1 }
 0x482   :  { %v1138_v25 = vpop.f32.mrf.mxu0 }
 0x483   :  { %v4372_v10 = vadd.f32 %v1138_v25, %v992_v18  ;;  %v1382_v52 = vpop.f32.mrf.mxu1 }
 0x484   :  { %v3557_v54 = vpop.f32.mrf.mxu0  ;;  %v1466_v57 = vsel %vm815_vm3, %v1382_v52, -inf }
 0x485   :  { %1467 = vmax.xlane.f32.xlu1 %v1466_v57  ;;  %v3576_v58 = vpop.f32.mrf.mxu1 }
 0x48a   :  { %v1226_v60 = vpop.f32.mrf.mxu0 }
 0x48b   :  { %v1460_v61 = vsel %vm808_vm2, %v1226_v60, -inf }
 0x48c   :  { %1461 = vmax.xlane.f32.xlu0 %v1460_v61  ;;  %v3564_v63 = vpop.f32.mrf.mxu0 }
 0x492   :  { %v1308_v0 = vpop.f32.mrf.mxu0 }
 0x493   :  { %v1463_v2 = vsel %vm808_vm2, %v1308_v0, -inf }
 0x494   :  { %1464 = vmax.xlane.f32.xlu0 %v1463_v2  ;;  %v3571_v3 = vpop.f32.mrf.mxu0 }
 0x496   :  { %v1456_v5 = vpop.f32.mrf.mxu0  ;;  %1917 = vrot.lane.b32.xlu1 %v4236_v45, %s3952_s3 }
 0x497   :  { %v1469_v6 = vsel %vm815_vm3, %v1456_v5, -inf }
 0x498   :  { %1470 = vmax.xlane.f32.xlu0 %v1469_v6  ;;  %v3581_v11 = vpop.f32.mrf.mxu0 }
 0x49a   :  { %1915 = vrot.lane.b32.xlu1 %v4227_v40, %s3952_s3 }
 0x49e   :  { %1913 = vrot.lane.b32.xlu1 %v4225_v39, %s3952_s3 }
 0x4a2   :  { %2069 = vrot.lane.b32.xlu1 %v4259_v49, %s3952_s3 }
 0x4a6   :  { %2259 = vrot.lane.b32.xlu1 %v4267_v51, %s3952_s3 }
 0x4aa   :  { %2337 = vrot.lane.b32.xlu1 %v4222_v37, %s3952_s3 }
 0x4ae   :  { %1835 = vrot.lane.b32.xlu0 %v4218_v33, %s3952_s3  ;;  %2416 = vrot.lane.b32.xlu1 %v4278_v55, %s3952_s3 }
 0x4b2   :  { %1833 = vrot.lane.b32.xlu0 %v4214_v12, %s3952_s3  ;;  %2414 = vrot.lane.b32.xlu1 %v4231_v42, %s3952_s3 }
 0x4b6   :  { %1831 = vrot.lane.b32.xlu0 %v4234_v43, %s3952_s3 }
 0x4ba   :  { %1995 = vrot.lane.b32.xlu0 %v4252_v46, %s3952_s3 }
 0x4be   :  { %2183 = vrot.lane.b32.xlu0 %v4256_v48, %s3952_s3 }
 0x4c2   :  { %2335 = vrot.lane.b32.xlu0 %v4216_v32, %s3952_s3 }
 0x50e   :  { %v1468_v7 = vpop.xlane.xlu1 %1467 }
 0x512   :  { %v1918_v34 = vpop.permute.xlu1 %1917 }
 0x515   :  { %v1462_v44 = vpop.xlane.xlu0 %1461 }
 0x516   :  { %v1472_v47 = vmax.f32 %v1462_v44, %v1468_v7  ;;  %v1916_v18 = vpop.permute.xlu1 %1915 }
 0x518   :  { %v1480_v50 = vsub.f32 %v1382_v52, %v1472_v47  ;;  %v1474_v53 = vsub.f32 %v1226_v60, %v1472_v47 }
 0x51a   :  { %v1482_v56 = vmul.f32 1.442695, %v1480_v50  ;;  %v1476_v59 = vmul.f32 1.442695, %v1474_v53  ;;  %v1914_v9 = vpop.permute.xlu1 %1913 }
 0x51c   :  { %3772 = vpow2.f32 %v1482_v56 }
 0x51d   :  { %v1465_v62 = vpop.xlane.xlu0 %1464  ;;  %3774 = vpow2.f32 %v1476_v59 }
 0x51e   :  { %v2070_v52 = vpop.permute.xlu1 %2069 }
 0x521   :  { %v1471_v1 = vpop.xlane.xlu0 %1470 }
 0x522   :  { %v1473_v4 = vmax.f32 %v1465_v62, %v1471_v1  ;;  %v2260_v54 = vpop.permute.xlu1 %2259 }
 0x524   :  { %v1481_v8 = vsub.f32 %v1456_v5, %v1473_v4  ;;  %v1475_v17 = vsub.f32 %v1308_v0, %v1473_v4 }
 0x525   :  { %v1836_v21 = vpop.permute.xlu0 %1835 }
 0x526   :  { %v1484_v26 = vmul.f32 1.442695, %v1481_v8  ;;  %v1478_v29 = vmul.f32 1.442695, %v1475_v17 }
 0x528   :  { %3776 = vpow2.f32 %v1484_v26 }
 0x529   :  { %v4406_v28 = vpop.eup %3772  ;;  %v1834_v30 = vpop.permute.xlu0 %1833  ;;  %3778 = vpow2.f32 %v1478_v29 }
 0x52a   :  { %3585 = vmatmul.mubr.msk.f32.vlgmr.msra.gmra.mxu1 %vm815_vm3, %v4406_v28  ;;  %v4413_v31 = vpop.eup %3774 }
 0x52b   :  { %3593 = vmatpush3.msra.mxu1 %v1659_v13  ;;  %3596 = vmatprep.mubr.msk.f32.mxu1 %vm3950_vm0, %v3949_v20 }
 0x52c   :  { %3594 = vmatprep.subr.mxu1 %v3949_v20 }
 0x52d   :  { %3595 = vmatpush3.msra.mxu1 %v1657_v16  ;;  %v1832_v35 = vpop.permute.xlu0 %1831 }
 0x52e   :  { %3606 = vmatprep.subr.mxu1 %v3949_v20  ;;  %3597 = vmatmul.mubr.msk.f32.vlgmr.msra.gmra.mxu1 %vm808_vm2, %v4413_v31 }
 0x52f   :  { %3607 = vmatpush3.xpose.msk.msra.mxu1 %vm503_vm1, %v1836_v21  ;;  %3610 = vmatprep.mubr.msk.f32.mxu1 %vm3950_vm0, %v3949_v20 }
 0x530   :  { %3608 = vmatprep.subr.mxu1 %v3949_v20 }
 0x531   :  { %v1996_v24 = vpop.permute.xlu0 %1995 }
 0x533   :  { %3609 = vmatpush3.xpose.msk.msra.mxu1 %vm503_vm1, %v1834_v30 }
 0x534   :  { %3620 = vmatprep.subr.mxu1 %v3949_v20 }
 0x535   :  { %v4424_v36 = vpop.eup %3776  ;;  %v2184_v25 = vpop.permute.xlu0 %2183 }
 0x536   :  { %3611 = vmatmul.mubr.msk.f32.vlgmr.msra.gmra.mxu1 %vm503_vm1, %v1832_v35  ;;  %3590 = vmatmul.mubr.msk.f32.vlgmr.msra.gmra.mxu0 %vm815_vm3, %v4424_v36  ;;  %v4435_v41 = vpop.eup %3778 }
 0x537   :  { %3600 = vmatpush3.msra.mxu0 %v1740_v15  ;;  %3621 = vmatpush3.xpose.msk.msra.mxu1 %vm503_vm1, %v1996_v24 }
 0x538   :  { %3601 = vmatprep.subr.mxu0 %v3949_v20  ;;  %3622 = vmatprep.mubr.msk.f32.mxu1 %vm3950_vm0, %v3949_v20 }
 0x539   :  { %3602 = vmatpush3.msra.mxu0 %v1738_v19  ;;  %3603 = vmatprep.mubr.msk.f32.mxu0 %vm3950_vm0, %v3949_v20  ;;  %v2336_v1 = vpop.permute.xlu0 %2335 }
 0x53a   :  { %3613 = vmatprep.subr.mxu0 %v3949_v20  ;;  %3623 = vmatmul.mubr.msk.f32.vlgmr.msra.gmra.mxu1 %vm503_vm1, %v1832_v35 }
 0x53b   :  { %3630 = vmatprep.subr.mxu1 %v3949_v20  ;;  %3604 = vmatmul.mubr.msk.f32.vlgmr.msra.gmra.mxu0 %vm808_vm2, %v4435_v41 }
 0x53c   :  { %3614 = vmatpush3.xpose.msk.msra.mxu0 %vm503_vm1, %v1918_v34  ;;  %3631 = vmatpush3.msra.mxu1 %v2184_v25 }
 0x53d   :  { %3615 = vmatprep.subr.mxu0 %v3949_v20  ;;  %3617 = vmatprep.mubr.msk.f32.mxu0 %vm3950_vm0, %v3949_v20 }
 0x53e   :  { %3632 = vmatprep.mubr.msk.f32.mxu1 %vm3950_vm0, %v3949_v20  ;;  %3640 = vmatprep.subr.mxu1 %v3949_v20 }
 0x540   :  { %3616 = vmatpush3.xpose.msk.msra.mxu0 %vm503_vm1, %v1916_v18 }
 0x541   :  { %3625 = vmatprep.subr.mxu0 %v3949_v20 }
 0x543   :  { %3618 = vmatmul.mubr.msk.f32.vlgmr.msra.gmra.mxu0 %vm503_vm1, %v1914_v9 }
 0x544   :  { %3626 = vmatpush3.xpose.msk.msra.mxu0 %vm503_vm1, %v2070_v52  ;;  %3627 = vmatprep.mubr.msk.f32.mxu0 %vm3950_vm0, %v3949_v20 }
 0x545   :  { %3635 = vmatprep.subr.mxu0 %v3949_v20 }
 0x547   :  { %3628 = vmatmul.mubr.msk.f32.vlgmr.msra.gmra.mxu0 %vm503_vm1, %v1914_v9 }
 0x548   :  { %3636 = vmatpush3.msra.mxu0 %v2260_v54  ;;  %3637 = vmatprep.mubr.msk.f32.mxu0 %vm3950_vm0, %v3949_v20 }
 0x549   :  { %3647 = vmatprep.subr.mxu0 %v3949_v20 }
 0x5ea   :  { %v1573_v57 = vpop.f32.mrf.mxu1 }
 0x5ec   :  { %v3586_v58 = vpop.f32.mrf.mxu1 }
 0x5ee   :  { %v1731_v60 = vpop.f32.mrf.mxu1 }
 0x5ef   :  { %v4460_v61 = vadd.f32 %v1731_v60, %v1573_v57 }
 0x5f0   :  { %v3598_v63 = vpop.f32.mrf.mxu1 }
 0x5f6   :  { %v1909_v0 = vpop.f32.mrf.mxu1  ;;  %v1650_v2 = vpop.f32.mrf.mxu0 }
 0x5f7   :  { %v2143_v3 = vsel %vm808_vm2, %v1909_v0, -inf }
 0x5f8   :  { %2144 = vmax.xlane.f32.xlu0 %v2143_v3  ;;  %v3612_v5 = vpop.f32.mrf.mxu1  ;;  %v3591_v6 = vpop.f32.mrf.mxu0 }
 0x5fa   :  { %v2065_v11 = vpop.f32.mrf.mxu1 }
 0x5fb   :  { %v1812_v13 = vpop.f32.mrf.mxu0  ;;  %v2149_v15 = vsel %vm815_vm3, %v2065_v11, -inf }
 0x5fc   :  { %v4464_v16 = vadd.f32 %v1812_v13, %v1650_v2  ;;  %2150 = vmax.xlane.f32.xlu1 %v2149_v15  ;;  %v3624_v19 = vpop.f32.mrf.mxu1 }
 0x5fd   :  { %v3605_v7 = vpop.f32.mrf.mxu0 }
 0x603   :  { %v1991_v44 = vpop.f32.mrf.mxu0 }
 0x604   :  { %v2146_v47 = vsel %vm808_vm2, %v1991_v44, -inf }
 0x605   :  { %v3619_v50 = vpop.f32.mrf.mxu0  ;;  %2147 = vmax.xlane.f32.xlu0 %v2146_v47 }
 0x607   :  { %v2139_v53 = vpop.f32.mrf.mxu0 }
 0x608   :  { %v2152_v56 = vsel %vm815_vm3, %v2139_v53, -inf }
 0x609   :  { %v3629_v59 = vpop.f32.mrf.mxu0  ;;  %2153 = vmax.xlane.f32.xlu0 %v2152_v56 }
 0x60d   :  { %2594 = vrot.lane.b32.xlu1 %v4236_v45, %s3953_s5  ;;  %v2338_v45 = vpop.permute.xlu1 %2337 }
 0x611   :  { %2592 = vrot.lane.b32.xlu1 %v4227_v40, %s3953_s5  ;;  %v2417_v40 = vpop.permute.xlu1 %2416 }
 0x615   :  { %2590 = vrot.lane.b32.xlu1 %v4225_v39, %s3953_s5  ;;  %v2415_v62 = vpop.permute.xlu1 %2414 }
 0x619   :  { %2746 = vrot.lane.b32.xlu1 %v4259_v49, %s3953_s5 }
 0x61f   :  { %2512 = vrot.lane.b32.xlu0 %v4218_v33, %s3953_s5 }
 0x623   :  { %2510 = vrot.lane.b32.xlu0 %v4214_v12, %s3953_s5 }
 0x627   :  { %2508 = vrot.lane.b32.xlu0 %v4234_v43, %s3953_s5 }
 0x62b   :  { %2672 = vrot.lane.b32.xlu0 %v4252_v46, %s3953_s5 }
 0x681   :  { %v2145_v39 = vpop.xlane.xlu0 %2144 }
 0x685   :  { %v2151_v4 = vpop.xlane.xlu1 %2150 }
 0x686   :  { %v2155_v8 = vmax.f32 %v2145_v39, %v2151_v4 }
 0x688   :  { %v2163_v49 = vsub.f32 %v2065_v11, %v2155_v8  ;;  %v2157_v21 = vsub.f32 %v1909_v0, %v2155_v8 }
 0x689   :  { %v2595_v52 = vpop.permute.xlu1 %2594 }
 0x68a   :  { %v2165_v17 = vmul.f32 1.442695, %v2163_v49  ;;  %v2159_v33 = vmul.f32 1.442695, %v2157_v21  ;;  %v1492_v49 = vsel %vm815_vm3, %v4406_v28, 0.0 }
 0x68c   :  { %3780 = vpow2.f32 %v2165_v17 }
 0x68d   :  { %3782 = vpow2.f32 %v2159_v33  ;;  %v2593_v58 = vpop.permute.xlu1 %2592 }
 0x68e   :  { %v2148_v26 = vpop.xlane.xlu0 %2147 }
 0x691   :  { %v2591_v63 = vpop.permute.xlu1 %2590 }
 0x692   :  { %v2154_v12 = vpop.xlane.xlu0 %2153 }
 0x693   :  { %v2156_v29 = vmax.f32 %v2148_v26, %v2154_v12 }
 0x695   :  { %v2164_v43 = vsub.f32 %v2139_v53, %v2156_v29  ;;  %v2158_v30 = vsub.f32 %v1991_v44, %v2156_v29  ;;  %v2747_v0 = vpop.permute.xlu1 %2746 }
 0x696   :  { %v2513_v34 = vpop.permute.xlu0 %2512 }
 0x697   :  { %v2167_v46 = vmul.f32 1.442695, %v2164_v43  ;;  %v2161_v18 = vmul.f32 1.442695, %v2158_v30 }
 0x699   :  { %v4484_v35 = vpop.eup %3780  ;;  %3784 = vpow2.f32 %v2167_v46 }
 0x69a   :  { %v2511_v24 = vpop.permute.xlu0 %2510  ;;  %3633 = vmatmul.mubr.msk.f32.vlgmr.msra.gmra.mxu1 %vm815_vm3, %v4484_v35  ;;  %v4491_v9 = vpop.eup %3782  ;;  %3786 = vpow2.f32 %v2161_v18 }
 0x69b   :  { %3641 = vmatpush3.msra.mxu1 %v2338_v45  ;;  %3644 = vmatprep.mubr.msk.f32.mxu1 %vm3950_vm0, %v3949_v20 }
 0x69c   :  { %3642 = vmatprep.subr.mxu1 %v3949_v20 }
 0x69d   :  { %3643 = vmatpush3.msra.mxu1 %v2336_v1 }
 0x69e   :  { %3654 = vmatprep.subr.mxu1 %v3949_v20  ;;  %3645 = vmatmul.mubr.msk.f32.vlgmr.msra.gmra.mxu1 %vm808_vm2, %v4491_v9  ;;  %v2509_v25 = vpop.permute.xlu0 %2508 }
 0x69f   :  { %3655 = vmatpush3.xpose.msk.msra.mxu1 %vm503_vm1, %v2513_v34  ;;  %3658 = vmatprep.mubr.msk.f32.mxu1 %vm3950_vm0, %v3949_v20 }
 0x6a0   :  { %3656 = vmatprep.subr.mxu1 %v3949_v20 }
 0x6a2   :  { %v2673_v57 = vpop.permute.xlu0 %2672 }
 0x6a3   :  { %3657 = vmatpush3.xpose.msk.msra.mxu1 %vm503_vm1, %v2511_v24 }
 0x6a4   :  { %3668 = vmatprep.subr.mxu1 %v3949_v20 }
 0x6a6   :  { %v4502_v54 = vpop.eup %3784  ;;  %3659 = vmatmul.mubr.msk.f32.vlgmr.msra.gmra.mxu1 %vm503_vm1, %v2509_v25 }
 0x6a7   :  { %3638 = vmatmul.mubr.msk.f32.vlgmr.msra.gmra.mxu0 %vm815_vm3, %v4502_v54  ;;  %3669 = vmatpush3.xpose.msk.msra.mxu1 %vm503_vm1, %v2673_v57  ;;  %v4513_v60 = vpop.eup %3786 }
 0x6a8   :  { %3648 = vmatpush3.msra.mxu0 %v2417_v40  ;;  %3670 = vmatprep.mubr.msk.f32.mxu1 %vm3950_vm0, %v3949_v20  ;;  %v2172_v28 = vsel %vm808_vm2, %v4513_v60, 0.0 }
 0x6a9   :  { %3649 = vmatprep.subr.mxu0 %v3949_v20  ;;  %3651 = vmatprep.mubr.msk.f32.mxu0 %vm3950_vm0, %v3949_v20 }
 0x6aa   :  { %3650 = vmatpush3.msra.mxu0 %v2415_v62  ;;  %3671 = vmatmul.mubr.msk.f32.vlgmr.msra.gmra.mxu1 %vm503_vm1, %v2509_v25 }
 0x6ab   :  { %3661 = vmatprep.subr.mxu0 %v3949_v20  ;;  %3652 = vmatmul.mubr.msk.f32.vlgmr.msra.gmra.mxu0 %vm808_vm2, %v4513_v60 }
 0x6ac   :  { %3662 = vmatpush3.xpose.msk.msra.mxu0 %vm503_vm1, %v2595_v52  ;;  %3665 = vmatprep.mubr.msk.f32.mxu0 %vm3950_vm0, %v3949_v20 }
 0x6ad   :  { %3663 = vmatprep.subr.mxu0 %v3949_v20  ;;  %3678 = vmatprep.subr.mxu1 %v3949_v20 }
 0x6ae   :  { %3680 = vmatprep.mubr.msk.f32.mxu1 %vm3950_vm0, %v3949_v20 }
 0x6b0   :  { %3664 = vmatpush3.xpose.msk.msra.mxu0 %vm503_vm1, %v2593_v58 }
 0x6b1   :  { %3673 = vmatprep.subr.mxu0 %v3949_v20 }
 0x6b3   :  { %3666 = vmatmul.mubr.msk.f32.vlgmr.msra.gmra.mxu0 %vm503_vm1, %v2591_v63 }
 0x6b4   :  { %3674 = vmatpush3.xpose.msk.msra.mxu0 %vm503_vm1, %v2747_v0  ;;  %3675 = vmatprep.mubr.msk.f32.mxu0 %vm3950_vm0, %v3949_v20 }
 0x6b5   :  { %3683 = vmatprep.subr.mxu0 %v3949_v20 }
 0x6b7   :  { %3676 = vmatmul.mubr.msk.f32.vlgmr.msra.gmra.mxu0 %vm503_vm1, %v2591_v63 }
 0x6b8   :  { %3685 = vmatprep.mubr.msk.f32.mxu0 %vm3950_vm0, %v3949_v20 }
 0x75a   :  { %v2255_v2 = vpop.f32.mrf.mxu1 }
 0x75c   :  { %v3634_v3 = vpop.f32.mrf.mxu1 }
 0x75e   :  { %v2410_v5 = vpop.f32.mrf.mxu1 }
 0x75f   :  { %v4536_v6 = vadd.f32 %v2410_v5, %v2255_v2 }
 0x760   :  { %v3646_v11 = vpop.f32.mrf.mxu1 }
 0x761   :  { %v836_v11 = vsel %vm808_vm2, %v4323_v23, 0.0 }
 0x766   :  { %v2586_v13 = vpop.f32.mrf.mxu1 }
 0x767   :  { %v2331_v15 = vpop.f32.mrf.mxu0  ;;  %v2820_v19 = vsel %vm808_vm2, %v2586_v13, -inf }
 0x768   :  { %2821 = vmax.xlane.f32.xlu0 %v2820_v19  ;;  %v3660_v7 = vpop.f32.mrf.mxu1  ;;  %v845_v19 = vsel %vm815_vm3, %v4320_v22, 0.0 }
 0x769   :  { %v3639_v44 = vpop.f32.mrf.mxu0 }
 0x76a   :  { %v2742_v47 = vpop.f32.mrf.mxu1 }
 0x76b   :  { %v2489_v50 = vpop.f32.mrf.mxu0  ;;  %v2826_v53 = vsel %vm815_vm3, %v2742_v47, -inf }
 0x76c   :  { %v4540_v56 = vadd.f32 %v2489_v50, %v2331_v15  ;;  %2827 = vmax.xlane.f32.xlu1 %v2826_v53  ;;  %v3672_v59 = vpop.f32.mrf.mxu1  ;;  %v839_v15 = vsel %vm808_vm2, %v4336_v27, 0.0 }
 0x76d   :  { %v3653_v45 = vpop.f32.mrf.mxu0 }
 0x773   :  { %v2668_v40 = vpop.f32.mrf.mxu0 }
 0x774   :  { %v2823_v62 = vsel %vm808_vm2, %v2668_v40, -inf }
 0x775   :  { %v3667_v1 = vpop.f32.mrf.mxu0  ;;  %2824 = vmax.xlane.f32.xlu0 %v2823_v62 }
 0x777   :  { %v2816_v39 = vpop.f32.mrf.mxu0 }
 0x778   :  { %v2829_v4 = vsel %vm815_vm3, %v2816_v39, -inf }
 0x779   :  { %v3677_v8 = vpop.f32.mrf.mxu0  ;;  %2830 = vmax.xlane.f32.xlu0 %v2829_v4 }
 0x77d   :  { %2936 = vrot.lane.b32.xlu1 %v4267_v51, %s3953_s5  ;;  %v2175_v51 = vsel %vm815_vm3, %v4484_v35, 0.0 }
 0x781   :  { %3014 = vrot.lane.b32.xlu1 %v4222_v37, %s3953_s5  ;;  %v1486_v37 = vsel %vm808_vm2, %v4413_v31, 0.0 }
 0x785   :  { %3093 = vrot.lane.b32.xlu1 %v4278_v55, %s3953_s5  ;;  %v2169_v55 = vsel %vm808_vm2, %v4491_v9, 0.0 }
 0x789   :  { %3091 = vrot.lane.b32.xlu1 %v4231_v42, %s3953_s5  ;;  %v2178_v42 = vsel %vm815_vm3, %v4502_v54, 0.0 }
 0x78f   :  { %2860 = vrot.lane.b32.xlu0 %v4256_v48, %s3953_s5  ;;  %v1489_v48 = vsel %vm808_vm2, %v4435_v41, 0.0 }
 0x793   :  { %3012 = vrot.lane.b32.xlu0 %v4216_v32, %s3953_s5  ;;  %v1495_v32 = vsel %vm815_vm3, %v4424_v36, 0.0 }
 0x7ad   :  { %1493 = vadd.xlane.f32.xlu1 %v1492_v49 }
 0x7b1   :  { %2176 = vadd.xlane.f32.xlu1 %v2175_v51 }
 0x7b2   :  { %1487 = vadd.xlane.f32.xlu0 %v1486_v37  ;;  %v3202_v37 = vld [vmem:[#allocation11 + $0x78] sm:$0xff] }
 0x7b5   :  { %2179 = vadd.xlane.f32.xlu1 %v2178_v42  ;;  %v3200_v42 = vld [vmem:[#allocation11 + $0x68] sm:$0xff] }
 0x7b6   :  { %1490 = vadd.xlane.f32.xlu0 %v1489_v48  ;;  %v3198_v48 = vld [vmem:[#allocation11 + $0x58] sm:$0xff] }
 0x7ba   :  { %1496 = vadd.xlane.f32.xlu0 %v1495_v32 }
 0x7be   :  { %2170 = vadd.xlane.f32.xlu0 %v2169_v55 }
 0x7c2   :  { %2173 = vadd.xlane.f32.xlu0 %v2172_v28 }
 0x7f1   :  { %v2822_v31 = vpop.xlane.xlu0 %2821 }
 0x7f5   :  { %v2828_v21 = vpop.xlane.xlu1 %2827 }
 0x7f6   :  { %v2832_v17 = vmax.f32 %v2822_v31, %v2828_v21 }
 0x7f8   :  { %v2834_v33 = vsub.f32 %v2586_v13, %v2832_v17  ;;  %v2840_v26 = vsub.f32 %v2742_v47, %v2832_v17  ;;  %v842_v13 = vsel %vm815_vm3, %v4312_v14, 0.0 }
 0x7f9   :  { %v2937_v41 = vpop.permute.xlu1 %2936 }
 0x7fa   :  { %v2836_v12 = vmul.f32 1.442695, %v2834_v33  ;;  %v2842_v29 = vmul.f32 1.442695, %v2840_v26  ;;  %3684 = vmatpush3.msra.mxu0 %v2937_v41 }
 0x7fb   :  { %3695 = vmatprep.subr.mxu0 %v3949_v20 }
 0x7fc   :  { %3788 = vpow2.f32 %v2836_v12 }
 0x7fd   :  { %3790 = vpow2.f32 %v2842_v29  ;;  %v3015_v54 = vpop.permute.xlu1 %3014 }
 0x7fe   :  { %v2825_v36 = vpop.xlane.xlu0 %2824 }
 0x801   :  { %v3094_v60 = vpop.permute.xlu1 %3093 }
 0x802   :  { %v2831_v43 = vpop.xlane.xlu0 %2830 }
 0x803   :  { %v2833_v30 = vmax.f32 %v2825_v36, %v2831_v43 }
 0x805   :  { %v2835_v34 = vsub.f32 %v2668_v40, %v2833_v30  ;;  %v2841_v46 = vsub.f32 %v2816_v39, %v2833_v30  ;;  %v3092_v5 = vpop.permute.xlu1 %3091 }
 0x806   :  { %v2861_v35 = vpop.permute.xlu0 %2860 }
 0x807   :  { %v2838_v18 = vmul.f32 1.442695, %v2835_v34  ;;  %v2844_v24 = vmul.f32 1.442695, %v2841_v46  ;;  %3679 = vmatpush3.msra.mxu1 %v2861_v35  ;;  %v3196_v46 = vld [vmem:[#allocation11 + $0x48] sm:$0xff]  ;;  %v3195_v35 = vld [vmem:[#allocation11 + $0x40] sm:$0xff] }
 0x808   :  { %3688 = vmatprep.subr.mxu1 %v3949_v20 }
 0x809   :  { %v3789_v9 = vpop.eup %3788  ;;  %3792 = vpow2.f32 %v2838_v18 }
 0x80a   :  { %v3791_v25 = vpop.eup %3790  ;;  %3794 = vpow2.f32 %v2844_v24  ;;  %v2846_v52 = vsel %vm808_vm2, %v3789_v9, 0.0  ;;  %v3013_v58 = vpop.permute.xlu0 %3012  ;;  %v3194_v24 = vld [vmem:[#allocation11 + $0x38] sm:$0xff] }
 0x80b   :  { %3681 = vmatmul.mubr.msk.f32.vlgmr.msra.gmra.mxu1 %vm815_vm3, %v3791_v25  ;;  %v2852_v57 = vsel %vm815_vm3, %v3791_v25, 0.0  ;;  %2847 = vadd.xlane.f32.xlu0 %v2846_v52 }
 0x80c   :  { %3689 = vmatpush3.msra.mxu1 %v3015_v54  ;;  %2853 = vadd.xlane.f32.xlu1 %v2852_v57  ;;  %v3192_v54 = vld [vmem:[#allocation11 + $0x28] sm:$0xff] }
 0x80d   :  { %3690 = vmatprep.subr.mxu1 %v3949_v20  ;;  %3692 = vmatprep.mubr.msk.f32.mxu1 %vm3950_vm0, %v3949_v20 }
 0x80e   :  { %3691 = vmatpush3.msra.mxu1 %v3013_v58  ;;  %v3191_v58 = vld [vmem:[#allocation11 + $0x20] sm:$0xff] }
 0x80f   :  { %3693 = vmatmul.mubr.msk.f32.vlgmr.msra.gmra.mxu1 %vm808_vm2, %v3789_v9  ;;  %3702 = vmatprep.subr.mxu1 %v3202_v37  ;;  %v3193_v9 = vld [vmem:[#allocation11 + $0x30] sm:$0xff] }
 0x810   :  { %3703 = vmatpush3.msra.mxu1 %v3202_v37 }
 0x816   :  { %v3793_v63 = vpop.eup %3792 }
 0x817   :  { %v3795_v0 = vpop.eup %3794  ;;  %v2849_v2 = vsel %vm808_vm2, %v3793_v63, 0.0 }
 0x818   :  { %3686 = vmatmul.mubr.msk.f32.vlgmr.msra.gmra.mxu0 %vm815_vm3, %v3795_v0  ;;  %v2855_v3 = vsel %vm815_vm3, %v3795_v0, 0.0  ;;  %2850 = vadd.xlane.f32.xlu0 %v2849_v2 }
 0x819   :  { %3696 = vmatpush3.msra.mxu0 %v3094_v60  ;;  %2856 = vadd.xlane.f32.xlu1 %v2855_v3 }
 0x81a   :  { %3697 = vmatprep.subr.mxu0 %v3949_v20  ;;  %3699 = vmatprep.mubr.msk.f32.mxu0 %vm3950_vm0, %v3949_v20 }
 0x81b   :  { %3698 = vmatpush3.msra.mxu0 %v3092_v5  ;;  %v3190_v5 = vld [vmem:[#allocation11 + $0x18] sm:$0xff] }
 0x81c   :  { %3700 = vmatmul.mubr.msk.f32.vlgmr.msra.gmra.mxu0 %vm808_vm2, %v3793_v63  ;;  %837 = vadd.xlane.f32.xlu0 %v836_v11  ;;  %v3189_v11 = vld [vmem:[#allocation11 + $0x10] sm:$0xff] }
 0x81d   :  { %843 = vadd.xlane.f32.xlu1 %v842_v13  ;;  %v3188_v13 = vld [vmem:[#allocation11 + $0x8] sm:$0xff] }
 0x820   :  { %840 = vadd.xlane.f32.xlu0 %v839_v15 }
 0x821   :  { %846 = vadd.xlane.f32.xlu1 %v845_v19  ;;  %v3187_v19 = vld [vmem:[#allocation11] sm:$0xff] }
 0x836   :  { %v1494_v20 = vpop.xlane.xlu1 %1493 }
 0x83a   :  { %v2177_v53 = vpop.xlane.xlu1 %2176 }
 0x83b   :  { %v1488_v7 = vpop.xlane.xlu0 %1487 }
 0x83c   :  { %v1498_v44 = vadd.f32 %v1494_v20, %v1488_v7 }
 0x83e   :  { %3796 = vrcp.f32 %v1498_v44  ;;  %v2180_v40 = vpop.xlane.xlu1 %2179 }
 0x83f   :  { %v1491_v23 = vpop.xlane.xlu0 %1490 }
 0x843   :  { %v1497_v47 = vpop.xlane.xlu0 %1496 }
 0x844   :  { %v1499_v50 = vadd.f32 %v1497_v47, %v1491_v23 }
 0x846   :  { %3798 = vrcp.f32 %v1499_v50 }
 0x847   :  { %v2171_v14 = vpop.xlane.xlu0 %2170 }
 0x848   :  { %v2181_v59 = vadd.f32 %v2177_v53, %v2171_v14 }
 0x84a   :  { %3800 = vrcp.f32 %v2181_v59 }
 0x84b   :  { %v3797_v45 = vpop.eup %3796  ;;  %v2174_v27 = vpop.xlane.xlu0 %2173 }
 0x84c   :  { %v2182_v62 = vadd.f32 %v2180_v40, %v2174_v27  ;;  %v1818_v22 = vmul.f32 %v3797_v45, %v4460_v61  ;;  %v3201_v61 = vld [vmem:[#allocation11 + $0x70] sm:$0xff] }
 0x84d   :  { %3704 = vmatprep.subr.mxu1 %v3201_v61 }
 0x84e   :  { %3802 = vrcp.f32 %v2182_v62  ;;  %1822 = vrot.lane.b32.xlu0 %v1818_v22, %s3953_s5  ;;  %3705 = vmatpush3.msra.mxu1 %v3201_v61 }
 0x84f   :  { %3706 = vmatprep.subr.mxu1 %v3200_v42 }
 0x850   :  { %3707 = vmatpush3.msra.mxu1 %v3200_v42 }
 0x853   :  { %v3799_v1 = vpop.eup %3798 }
 0x854   :  { %v1819_v39 = vmul.f32 %v3799_v1, %v4464_v16  ;;  %v3199_v16 = vld [vmem:[#allocation11 + $0x60] sm:$0xff] }
 0x855   :  { %3708 = vmatprep.subr.mxu1 %v3199_v16 }
 0x856   :  { %1824 = vrot.lane.b32.xlu1 %v1819_v39, %s3953_s5  ;;  %3709 = vmatpush3.msra.mxu1 %v3199_v16 }
 0x857   :  { %v3801_v4 = vpop.eup %3800  ;;  %3710 = vmatprep.subr.mxu1 %v3198_v48 }
 0x858   :  { %v2495_v8 = vmul.f32 %v3801_v4, %v4536_v6  ;;  %v3197_v6 = vld [vmem:[#allocation11 + $0x50] sm:$0xff]  ;;  %3711 = vmatpush3.msra.mxu1 %v3198_v48 }
 0x859   :  { %3712 = vmatprep.subr.mxu1 %v3197_v6 }
 0x85a   :  { %2499 = vrot.lane.b32.xlu1 %v2495_v8, %s3952_s3  ;;  %3713 = vmatpush3.msra.mxu1 %v3197_v6 }
 0x85b   :  { %v3803_v49 = vpop.eup %3802  ;;  %3714 = vmatprep.subr.mxu1 %v3196_v46 }
 0x85c   :  { %v2496_v51 = vmul.f32 %v3803_v49, %v4540_v56  ;;  %3715 = vmatpush3.msra.mxu1 %v3196_v46 }
 0x85d   :  { %3716 = vmatprep.subr.mxu1 %v3195_v35 }
 0x85e   :  { %2501 = vrot.lane.b32.xlu1 %v2496_v51, %s3952_s3  ;;  %3717 = vmatpush3.msra.mxu1 %v3195_v35 }
 0x85f   :  { %3718 = vmatprep.subr.mxu1 %v3194_v24 }
 0x860   :  { %3719 = vmatpush3.msra.mxu1 %v3194_v24 }
 0x861   :  { %3720 = vmatprep.subr.mxu1 %v3193_v9 }
 0x862   :  { %3721 = vmatpush3.msra.mxu1 %v3193_v9 }
 0x863   :  { %3722 = vmatprep.subr.mxu1 %v3192_v54 }
 0x864   :  { %3723 = vmatpush3.msra.mxu1 %v3192_v54 }
 0x865   :  { %3724 = vmatprep.subr.mxu1 %v3191_v58 }
 0x866   :  { %3725 = vmatpush3.msra.mxu1 %v3191_v58 }
 0x867   :  { %3726 = vmatprep.subr.mxu1 %v3190_v5 }
 0x868   :  { %3727 = vmatpush3.msra.mxu1 %v3190_v5 }
 0x869   :  { %3728 = vmatprep.subr.mxu1 %v3189_v11 }
 0x86a   :  { %3729 = vmatpush3.msra.mxu1 %v3189_v11 }
 0x86b   :  { %3730 = vmatprep.subr.mxu1 %v3188_v13 }
 0x86c   :  { %3731 = vmatpush3.msra.mxu1 %v3188_v13 }
 0x86d   :  { %3732 = vmatprep.subr.mxu1 %v3187_v19 }
 0x86e   :  { %3733 = vmatpush3.msra.mxu1 %v3187_v19 }
 0x894   :  { %v2848_v56 = vpop.xlane.xlu0 %2847 }
 0x895   :  { %v2854_v32 = vpop.xlane.xlu1 %2853 }
 0x896   :  { %v2858_v30 = vadd.f32 %v2854_v32, %v2848_v56 }
 0x8a1   :  { %v2851_v55 = vpop.xlane.xlu0 %2850 }
 0x8a2   :  { %v2857_v28 = vpop.xlane.xlu1 %2856 }
 0x8a3   :  { %v2859_v25 = vadd.f32 %v2857_v28, %v2851_v55 }
 0x8a5   :  { %v838_v31 = vpop.xlane.xlu0 %837 }
 0x8a6   :  { %v844_v21 = vpop.xlane.xlu1 %843 }
 0x8a7   :  { %v848_v17 = vadd.f32 %v844_v21, %v838_v31 }
 0x8a9   :  { %3804 = vrcp.f32 %v848_v17  ;;  %v841_v33 = vpop.xlane.xlu0 %840 }
 0x8aa   :  { %v847_v26 = vpop.xlane.xlu1 %846 }
 0x8ab   :  { %v849_v41 = vadd.f32 %v847_v26, %v841_v33 }
 0x8ad   :  { %3806 = vrcp.f32 %v849_v41 }
 0x8ae   :  { %3808 = vrcp.f32 %v2858_v30 }
 0x8af   :  { %3810 = vrcp.f32 %v2859_v25 }
 0x8b6   :  { %v3805_v12 = vpop.eup %3804 }
 0x8b7   :  { %v1144_v29 = vmul.f32 %v3805_v12, %v4370_v38 }
 0x8b9   :  { %1146 = vst.msk [vmem:[#allocation2] sm:$0xff] %vm503_vm1, %v1144_v29 }
 0x8ba   :  { %v3807_v36 = vpop.eup %3806 }
 0x8bb   :  { %v1145_v43 = vmul.f32 %v3807_v36, %v4372_v10  ;;  %v3809_v0 = vpop.eup %3808 }
 0x8bc   :  { %v3811_v23 = vpop.eup %3810 }
 0x8bd   :  { %1147 = vst.msk [vmem:[#allocation2 + $0x8] sm:$0xff] %vm503_vm1, %v1145_v43 }
 0x8c0   :  { %v1823_v34 = vpop.permute.xlu0 %1822 }
 0x8c1   :  { %1829 = vst.msk [vmem:[#allocation2] sm:$0xff] %vm1828_vm4, %v1823_v34 }
 0x8c8   :  { %v1825_v18 = vpop.permute.xlu1 %1824 }
 0x8c9   :  { %1830 = vst.msk [vmem:[#allocation2 + $0x8] sm:$0xff] %vm1828_vm4, %v1825_v18 }
 0x8cb   :  { %v2932_v38 = vpop.f32.mrf.mxu1 }
 0x8cc   :  { %v2500_v10 = vpop.permute.xlu1 %2499 }
 0x8cd   :  { %2506 = vst.msk [vmem:[#allocation2] sm:$0xff] %vm2505_vm5, %v2500_v10  ;;  %v3682_v52 = vpop.f32.mrf.mxu1 }
 0x8cf   :  { %v3087_v57 = vpop.f32.mrf.mxu1 }
 0x8d0   :  { %v3088_v60 = vadd.f32 %v3087_v57, %v2932_v38  ;;  %v2502_v63 = vpop.permute.xlu1 %2501 }
 0x8d1   :  { %2507 = vst.msk [vmem:[#allocation2 + $0x8] sm:$0xff] %vm2505_vm5, %v2502_v63  ;;  %v3694_v2 = vpop.f32.mrf.mxu1 }
 0x8d2   :  { %v3172_v3 = vmul.f32 %v3809_v0, %v3088_v60 }
 0x8d4   :  { %3176 = vrot.lane.b32.xlu0 %v3172_v3, %s3951_s2 }
 0x8d8   :  { %v3008_v15 = vpop.f32.mrf.mxu0 }
 0x8da   :  { %v3687_v20 = vpop.f32.mrf.mxu0 }
 0x8dc   :  { %v3166_v7 = vpop.f32.mrf.mxu0 }
 0x8dd   :  { %v3167_v44 = vadd.f32 %v3166_v7, %v3008_v15 }
 0x8de   :  { %v3701_v47 = vpop.f32.mrf.mxu0 }
 0x8df   :  { %v3173_v50 = vmul.f32 %v3811_v23, %v3167_v44 }
 0x8e1   :  { %3178 = vrot.lane.b32.xlu1 %v3173_v50, %s3951_s2 }
 0x946   :  { %v3177_v53 = vpop.permute.xlu0 %3176 }
 0x947   :  { %3183 = vst.msk [vmem:[#allocation2] sm:$0xff] %vm3182_vm6, %v3177_v53 }
 0x94e   :  { %v3185_v14 = vld [vmem:[#allocation2] sm:$0xff] }
 0x94f   :  { %3734 = vmatprep.mubr.f32.mxu1 %v3185_v14 }
 0x953   :  { %v3179_v59 = vpop.permute.xlu1 %3178 }
 0x954   :  { %3184 = vst.msk [vmem:[#allocation2 + $0x8] sm:$0xff] %vm3182_vm6, %v3179_v59 }
 0x95b   :  { %v3186_v45 = vld [vmem:[#allocation2 + $0x8] sm:$0xff] }
 0x95c   :  { %3735 = vmatmul.mubr.f32.vlgmr.msra.gmra.mxu1 %v3186_v45 }
 0xa1c   :  { %v3736_v40 = vpop.f32.mrf.mxu1 }
 0xa1d   :  { %3279 = vst [vmem:[#allocation12 + $0x8] sm:$0xff] %v3736_v40 }
 0xa1e   :  { %v3269_v27 = vpop.f32.mrf.mxu1 }
 0xa1f   :  { %3278 = vst [vmem:[#allocation12] sm:$0xff] %v3269_v27 }
 0xa20   :  { %3923 = shalt.err (!%p3920_p1)
}
 0xa21   :  { %3291 = dma.vmem_to_hbm [thread:$0]  %s3286_s22, 256, %s4627_s9, [#allocation5], %s3942_s14, %s3942_s14, %s3943_s15  }
 0xa22   :  { %3938 = dma.done.wait [#allocation5], 256  }
 0xa23   :  { %3939 = vsyncadd [#allocation5], 4294967040 }
 0xa24   :  { %3295 = vsyncpa [#allocation4], 1 }
 0xa25   :  { %3296 = vsyncpa [#allocation7], 1 }
 0xa26   :  { %3297 = vsyncpa [#allocation10], 1 }
 0xa27   :  { %3298 = vsyncpa [#allocation5], 1 }

</bundles_post_ra>
